<compile_context>
chip_gen: v7x
topology: tpu7x:2x2x1
jax: 0.10.0
libtpu: 0.0.40
codegen_flags: <defaults>
</compile_context>

<pallas_src>
import jax
import jax.numpy as jnp
from jax.experimental import pallas as pl
from jax.experimental.pallas import tpu as pltpu

# ---------------- model hyperparameters (small, synthetic) ----------------
B = 2          # batch
C = 4          # image channels
IMG = 16       # image spatial size (H = W)
PATCH = 4      # patch size -> 4x4 = 16 image tokens
S = 8          # text sequence length
HID = 32       # hidden size
FF = 64        # feed-forward size
VOCAB = 50
NUM_PATCH = (IMG // PATCH) ** 2          # 16
PATCH_DIM = C * PATCH * PATCH            # 64
L = NUM_PATCH + S                        # 24 fused tokens
NUM_CLASSES = 2
ATT_SCALE = 1.0 / float(HID) ** 0.5

# ---- packed-weight layout ----
# w_hid slab: (HID, 256) columns = [wq | wk | wv | wo | wff1 | wpool | wcls_pad]
C_O = 3 * HID            # 96
C_FF1 = 4 * HID          # 128
C_POOL = 4 * HID + FF    # 192
C_CLS = C_POOL + HID     # 224
# w64 slab: (64, 64) columns = [w_imgp (PATCH_DIM rows) | wff2 (FF rows)]
# vec slab: (48, FF) rows = [pos_emb (L rows) | per-row vectors below]
VEC_W = FF
R_BIMG = L + 0
R_TIMG = L + 1
R_TTXT = L + 2
R_LNE_G = L + 3
R_LNE_B = L + 4
R_BQ = L + 5
R_BK = L + 6
R_BV = L + 7
R_BO = L + 8
R_LN1_G = L + 9
R_LN1_B = L + 10
R_BFF1 = L + 11
R_BFF2 = L + 12
R_LN2_G = L + 13
R_LN2_B = L + 14
R_BPOOL = L + 15
R_BCLS = L + 16


# ---------------------------- kernel helpers -------------------------------
def _layernorm(x, g, b, eps=1e-12):
    mu = jnp.mean(x, axis=-1, keepdims=True)
    var = jnp.mean((x - mu) ** 2, axis=-1, keepdims=True)
    return (x - mu) * jax.lax.rsqrt(var + eps) * g + b


def _softmax_last(x):
    m = jnp.max(x, axis=-1, keepdims=True)
    e = jnp.exp(x - m)
    return e * pl.reciprocal(jnp.sum(e, axis=-1, keepdims=True), approx=True)


# ------------------------------- kernel ------------------------------------
def mmbt_kernel(img_ref, txt_ref, whid_ref, w64_ref, vec_ref, out_ref):
    def vrow(r, width=HID):                         # (1, width) bias/LN/type row
        return vec_ref[r:r + 1, 0:width]

    # --- multimodal embeddings (whole batch at once) ---
    img = img_ref[...].reshape(B * NUM_PATCH, PATCH_DIM)
    txt = txt_ref[...].reshape(B * S, HID)

    img_tok = (jnp.dot(img, w64_ref[:, 0:HID], preferred_element_type=jnp.float32)
               + vrow(R_BIMG) + vrow(R_TIMG))       # (B*NP, HID)
    txt_tok = txt + vrow(R_TTXT)                    # (B*S, HID)

    x3 = jnp.concatenate(
        [img_tok.reshape(B, NUM_PATCH, HID), txt_tok.reshape(B, S, HID)], axis=1)
    x3 = x3 + vec_ref[0:L, 0:HID]                   # fused-sequence position emb
    x = _layernorm(x3.reshape(B * L, HID), vrow(R_LNE_G), vrow(R_LNE_B))

    # --- transformer encoder layer: fused-QKV single-head self-attention ---
    # TODO(synk): no text-padding attention mask (synthetic inputs, fixed length).
    qkv = jnp.dot(x, whid_ref[:, 0:3 * HID], preferred_element_type=jnp.float32)
    q = (qkv[:, 0 * HID:1 * HID] + vrow(R_BQ)).reshape(B, L, HID)
    k = (qkv[:, 1 * HID:2 * HID] + vrow(R_BK)).reshape(B, L, HID)
    v = (qkv[:, 2 * HID:3 * HID] + vrow(R_BV)).reshape(B, L, HID)

    att = jnp.einsum("bqd,bkd->bqk", q, k, preferred_element_type=jnp.float32)
    att = _softmax_last(att * ATT_SCALE)
    ctx = jnp.einsum("bqk,bkd->bqd", att, v,
                     preferred_element_type=jnp.float32).reshape(B * L, HID)

    attn_out = (jnp.dot(ctx, whid_ref[:, C_O:C_O + HID],
                        preferred_element_type=jnp.float32) + vrow(R_BO))
    x = _layernorm(x + attn_out, vrow(R_LN1_G), vrow(R_LN1_B))

    # --- feed-forward ---
    # TODO(synk): HF/BERT MMBT uses exact erf-GELU; tanh approximation differs slightly.
    h1 = jax.nn.gelu(
        jnp.dot(x, whid_ref[:, C_FF1:C_FF1 + FF],
                preferred_element_type=jnp.float32) + vrow(R_BFF1, FF),
        approximate=True)
    ff = (jnp.dot(h1, w64_ref[:, HID:2 * HID],
                  preferred_element_type=jnp.float32) + vrow(R_BFF2))
    x = _layernorm(x + ff, vrow(R_LN2_G), vrow(R_LN2_B))

    # --- pooler ([CLS] = first fused token of each batch element) + classifier ---
    cls = jnp.concatenate([x[b * L:b * L + 1, :] for b in range(B)], axis=0)
    pooled = jnp.tanh(
        jnp.dot(cls, whid_ref[:, C_POOL:C_POOL + HID],
                preferred_element_type=jnp.float32) + vrow(R_BPOOL))
    logits = (jnp.dot(pooled, whid_ref[:, C_CLS:C_CLS + HID],
                      preferred_element_type=jnp.float32)
              + vrow(R_BCLS))[:, 0:NUM_CLASSES]     # (B, NUM_CLASSES)

    out_ref[0, :, :] = logits                       # model "scores"
    out_ref[1, :, :] = _softmax_last(logits)        # classify(): softmax(dim=1)


# --------------------------- weight packing ---------------------------------
def _pack_weights(p):
    w_hid = jnp.concatenate(
        [p["wq"], p["wk"], p["wv"], p["wo"], p["wff1"], p["wpool"],
         jnp.pad(p["wcls"], ((0, 0), (0, HID - NUM_CLASSES)))], axis=1)   # (HID, 256)
    w64 = jnp.concatenate([p["w_imgp"], p["wff2"]], axis=1)               # (64, 64)

    def row(v):
        return jnp.pad(v, ((0, 0), (0, VEC_W - v.shape[1])))

    vec_list = [jnp.pad(p["pos_emb"], ((0, 0), (0, VEC_W - HID)))]        # rows 0..L-1
    vec_list += [row(p[n]) for n in
                 ("b_imgp", "type_img", "type_txt", "ln_emb_g", "ln_emb_b",
                  "bq", "bk", "bv", "bo", "ln1_g", "ln1_b",
                  "bff1", "bff2", "ln2_g", "ln2_b", "bpool", "bcls")]
    vecs = jnp.concatenate(vec_list, axis=0)                              # (41, 64)
    vecs = jnp.pad(vecs, ((0, (-vecs.shape[0]) % 8), (0, 0)))             # (48, 64)
    return w_hid, w64, vecs


# ------------------------------- wrapper ------------------------------------
def mmbt_forward(image_nchw, input_ids, params):
    Bsz = image_nchw.shape[0]
    assert Bsz == B, "kernel is specialized to the module batch size"
    nph = IMG // PATCH

    # glue: NCHW -> (B, num_patches, C*patch*patch)
    patches = image_nchw.reshape(Bsz, C, nph, PATCH, nph, PATCH)
    patches = patches.transpose(0, 2, 4, 1, 3, 5).reshape(Bsz, NUM_PATCH, PATCH_DIM)

    # glue: word-embedding lookup
    txt_emb = jnp.take(params["word_emb"], input_ids, axis=0)  # (B, S, HID)

    w_hid, w64, vecs = _pack_weights(params)

    vmem_spec = pl.BlockSpec(memory_space=pltpu.MemorySpace.VMEM)
    out = pl.pallas_call(
        mmbt_kernel,
        out_shape=jax.ShapeDtypeStruct((2, Bsz, NUM_CLASSES), jnp.float32),
        in_specs=[vmem_spec] * 5,
        out_specs=vmem_spec,
    )(patches, txt_emb, w_hid, w64, vecs)

    return out[0], out[1]        # scores (logits), probs (softmax dim=1)


# ----------------------------- param init -----------------------------------
def init_params(key):
    def nrm(k, shape, scale=0.02):
        return (scale * jax.random.normal(k, shape)).astype(jnp.float32)

    ks = jax.random.split(key, 16)
    p = {
        "word_emb": nrm(ks[0], (VOCAB, HID)),
        "w_imgp": nrm(ks[1], (PATCH_DIM, HID)),
        "b_imgp": jnp.zeros((1, HID), jnp.float32),
        "pos_emb": nrm(ks[2], (L, HID)),
        "type_img": nrm(ks[3], (1, HID)),
        "type_txt": nrm(ks[4], (1, HID)),
        "ln_emb_g": jnp.ones((1, HID), jnp.float32),
        "ln_emb_b": jnp.zeros((1, HID), jnp.float32),
        "wq": nrm(ks[5], (HID, HID)), "bq": jnp.zeros((1, HID), jnp.float32),
        "wk": nrm(ks[6], (HID, HID)), "bk": jnp.zeros((1, HID), jnp.float32),
        "wv": nrm(ks[7], (HID, HID)), "bv": jnp.zeros((1, HID), jnp.float32),
        "wo": nrm(ks[8], (HID, HID)), "bo": jnp.zeros((1, HID), jnp.float32),
        "ln1_g": jnp.ones((1, HID), jnp.float32),
        "ln1_b": jnp.zeros((1, HID), jnp.float32),
        "wff1": nrm(ks[9], (HID, FF)), "bff1": jnp.zeros((1, FF), jnp.float32),
        "wff2": nrm(ks[10], (FF, HID)), "bff2": jnp.zeros((1, HID), jnp.float32),
        "ln2_g": jnp.ones((1, HID), jnp.float32),
        "ln2_b": jnp.zeros((1, HID), jnp.float32),
        "wpool": nrm(ks[11], (HID, HID)), "bpool": jnp.zeros((1, HID), jnp.float32),
        "wcls": nrm(ks[12], (HID, NUM_CLASSES)),
        "bcls": jnp.zeros((1, NUM_CLASSES), jnp.float32),
    }
    return p


# TODO(synk): the original interface's processor pipeline (tokenizer, PIL image
# loading/resizing) is host-side I/O with no Pallas equivalent; inputs here are
# synthetic image tensors and token ids.

if __name__ == "__main__":
    key = jax.random.PRNGKey(0)
    k_img, k_ids, k_par = jax.random.split(key, 3)

    image = jax.random.normal(k_img, (B, C, IMG, IMG), dtype=jnp.float32)  # NCHW
    input_ids = jax.random.randint(k_ids, (B, S), 0, VOCAB, dtype=jnp.int32)
    params = init_params(k_par)

    scores, probs = mmbt_forward(image, input_ids, params)
    jax.block_until_ready((scores, probs))
    print("KERNEL_OK")
</pallas_src>

<mosaic_0001>
module attributes {stable_mosaic.version = 11 : i64} {
  func.func @mmbt_kernel(%arg0: memref<2x16x64xf32, #tpu.memory_space<vmem>>, %arg1: memref<2x8x32xf32, #tpu.memory_space<vmem>>, %arg2: memref<32x256xf32, #tpu.memory_space<vmem>>, %arg3: memref<64x64xf32, #tpu.memory_space<vmem>>, %arg4: memref<48x64xf32, #tpu.memory_space<vmem>>, %arg5: memref<2x2x2xf32, #tpu.memory_space<vmem>>) attributes {dimension_semantics = [], scalar_prefetch = 0 : i64, scratch_operands = 0 : i64, tpu.core_type = #tpu.core_type<tc>} {
    %c0 = arith.constant 0 : index
    %c0_0 = arith.constant 0 : index
    %c0_1 = arith.constant 0 : index
    %0 = vector.load %arg0[%c0, %c0_0, %c0_1] : memref<2x16x64xf32, #tpu.memory_space<vmem>>, vector<2x16x64xf32>
    %1 = vector.shape_cast %0 : vector<2x16x64xf32> to vector<32x64xf32>
    %c0_2 = arith.constant 0 : index
    %c0_3 = arith.constant 0 : index
    %c0_4 = arith.constant 0 : index
    %2 = vector.load %arg1[%c0_2, %c0_3, %c0_4] : memref<2x8x32xf32, #tpu.memory_space<vmem>>, vector<2x8x32xf32>
    %3 = vector.shape_cast %2 : vector<2x8x32xf32> to vector<16x32xf32>
    %c0_5 = arith.constant 0 : index
    %c0_6 = arith.constant 0 : index
    %4 = vector.load %arg3[%c0_5, %c0_6] : memref<64x64xf32, #tpu.memory_space<vmem>>, vector<64x32xf32>
    %cst = arith.constant dense<0.000000e+00> : vector<32x32xf32>
    %5 = tpu.matmul %1, %4, %cst {dimension_numbers = #tpu.dot_dimension_numbers<[1], [0], [0], [1], [0, 0, 1, 1], [], []>} : vector<32x64xf32>, vector<64x32xf32>, vector<32x32xf32> -> vector<32x32xf32>
    %c24 = arith.constant 24 : index
    %c0_7 = arith.constant 0 : index
    %6 = vector.load %arg4[%c24, %c0_7] : memref<48x64xf32, #tpu.memory_space<vmem>>, vector<1x32xf32>
    %7 = vector.broadcast %6 : vector<1x32xf32> to vector<32x32xf32>
    %8 = arith.addf %5, %7 : vector<32x32xf32>
    %c25 = arith.constant 25 : index
    %c0_8 = arith.constant 0 : index
    %9 = vector.load %arg4[%c25, %c0_8] : memref<48x64xf32, #tpu.memory_space<vmem>>, vector<1x32xf32>
    %10 = vector.broadcast %9 : vector<1x32xf32> to vector<32x32xf32>
    %11 = arith.addf %8, %10 : vector<32x32xf32>
    %c26 = arith.constant 26 : index
    %c0_9 = arith.constant 0 : index
    %12 = vector.load %arg4[%c26, %c0_9] : memref<48x64xf32, #tpu.memory_space<vmem>>, vector<1x32xf32>
    %13 = vector.broadcast %12 : vector<1x32xf32> to vector<16x32xf32>
    %14 = arith.addf %3, %13 : vector<16x32xf32>
    %15 = vector.shape_cast %11 : vector<32x32xf32> to vector<2x16x32xf32>
    %16 = vector.shape_cast %14 : vector<16x32xf32> to vector<2x8x32xf32>
    %17 = tpu.concatenate %15, %16 in 1 : vector<2x16x32xf32>, vector<2x8x32xf32> -> vector<2x24x32xf32>
    %c0_10 = arith.constant 0 : index
    %c0_11 = arith.constant 0 : index
    %18 = vector.load %arg4[%c0_10, %c0_11] : memref<48x64xf32, #tpu.memory_space<vmem>>, vector<24x32xf32>
    %19 = vector.shape_cast %18 : vector<24x32xf32> to vector<1x24x32xf32>
    %20 = vector.broadcast %19 : vector<1x24x32xf32> to vector<2x24x32xf32>
    %21 = arith.addf %17, %20 : vector<2x24x32xf32>
    %22 = vector.shape_cast %21 : vector<2x24x32xf32> to vector<48x32xf32>
    %c27 = arith.constant 27 : index
    %c0_12 = arith.constant 0 : index
    %23 = vector.load %arg4[%c27, %c0_12] : memref<48x64xf32, #tpu.memory_space<vmem>>, vector<1x32xf32>
    %c28 = arith.constant 28 : index
    %c0_13 = arith.constant 0 : index
    %24 = vector.load %arg4[%c28, %c0_13] : memref<48x64xf32, #tpu.memory_space<vmem>>, vector<1x32xf32>
    %cst_14 = arith.constant dense<0.000000e+00> : vector<48xf32>
    %25 = vector.multi_reduction <add>, %22, %cst_14 [1] : vector<48x32xf32> to vector<48xf32>
    %26 = vector.shape_cast %25 : vector<48xf32> to vector<48x1xf32>
    %cst_15 = arith.constant 3.200000e+01 : f32
    %27 = vector.broadcast %cst_15 : f32 to vector<48x1xf32>
    %28 = arith.divf %26, %27 : vector<48x1xf32>
    %29 = vector.broadcast %28 : vector<48x1xf32> to vector<48x32xf32>
    %30 = arith.subf %22, %29 : vector<48x32xf32>
    %31 = arith.mulf %30, %30 : vector<48x32xf32>
    %cst_16 = arith.constant dense<0.000000e+00> : vector<48xf32>
    %32 = vector.multi_reduction <add>, %31, %cst_16 [1] : vector<48x32xf32> to vector<48xf32>
    %33 = vector.shape_cast %32 : vector<48xf32> to vector<48x1xf32>
    %cst_17 = arith.constant 3.200000e+01 : f32
    %34 = vector.broadcast %cst_17 : f32 to vector<48x1xf32>
    %35 = arith.divf %33, %34 : vector<48x1xf32>
    %36 = vector.broadcast %28 : vector<48x1xf32> to vector<48x32xf32>
    %37 = arith.subf %22, %36 : vector<48x32xf32>
    %cst_18 = arith.constant 9.99999996E-13 : f32
    %38 = vector.broadcast %cst_18 : f32 to vector<48x1xf32>
    %39 = arith.addf %35, %38 : vector<48x1xf32>
    %40 = math.rsqrt %39 : vector<48x1xf32>
    %41 = vector.broadcast %40 : vector<48x1xf32> to vector<48x32xf32>
    %42 = arith.mulf %37, %41 : vector<48x32xf32>
    %43 = vector.broadcast %23 : vector<1x32xf32> to vector<48x32xf32>
    %44 = arith.mulf %42, %43 : vector<48x32xf32>
    %45 = vector.broadcast %24 : vector<1x32xf32> to vector<48x32xf32>
    %46 = arith.addf %44, %45 : vector<48x32xf32>
    %c0_19 = arith.constant 0 : index
    %c0_20 = arith.constant 0 : index
    %47 = vector.load %arg2[%c0_19, %c0_20] : memref<32x256xf32, #tpu.memory_space<vmem>>, vector<32x96xf32>
    %cst_21 = arith.constant dense<0.000000e+00> : vector<48x96xf32>
    %48 = tpu.matmul %46, %47, %cst_21 {dimension_numbers = #tpu.dot_dimension_numbers<[1], [0], [0], [1], [0, 0, 1, 1], [], []>} : vector<48x32xf32>, vector<32x96xf32>, vector<48x96xf32> -> vector<48x96xf32>
    %49 = vector.extract_strided_slice %48 {offsets = [0, 0], sizes = [48, 32], strides = [1, 1]} : vector<48x96xf32> to vector<48x32xf32>
    %c29 = arith.constant 29 : index
    %c0_22 = arith.constant 0 : index
    %50 = vector.load %arg4[%c29, %c0_22] : memref<48x64xf32, #tpu.memory_space<vmem>>, vector<1x32xf32>
    %51 = vector.broadcast %50 : vector<1x32xf32> to vector<48x32xf32>
    %52 = arith.addf %49, %51 : vector<48x32xf32>
    %53 = vector.shape_cast %52 : vector<48x32xf32> to vector<2x24x32xf32>
    %54 = vector.extract_strided_slice %48 {offsets = [0, 32], sizes = [48, 32], strides = [1, 1]} : vector<48x96xf32> to vector<48x32xf32>
    %c30 = arith.constant 30 : index
    %c0_23 = arith.constant 0 : index
    %55 = vector.load %arg4[%c30, %c0_23] : memref<48x64xf32, #tpu.memory_space<vmem>>, vector<1x32xf32>
    %56 = vector.broadcast %55 : vector<1x32xf32> to vector<48x32xf32>
    %57 = arith.addf %54, %56 : vector<48x32xf32>
    %58 = vector.shape_cast %57 : vector<48x32xf32> to vector<2x24x32xf32>
    %59 = vector.extract_strided_slice %48 {offsets = [0, 64], sizes = [48, 32], strides = [1, 1]} : vector<48x96xf32> to vector<48x32xf32>
    %c31 = arith.constant 31 : index
    %c0_24 = arith.constant 0 : index
    %60 = vector.load %arg4[%c31, %c0_24] : memref<48x64xf32, #tpu.memory_space<vmem>>, vector<1x32xf32>
    %61 = vector.broadcast %60 : vector<1x32xf32> to vector<48x32xf32>
    %62 = arith.addf %59, %61 : vector<48x32xf32>
    %63 = vector.shape_cast %62 : vector<48x32xf32> to vector<2x24x32xf32>
    "tpu.trace_start"() <{level = 10 : i32, message = "bqd,bkd->bqk"}> : () -> ()
    %cst_25 = arith.constant dense<0.000000e+00> : vector<2x24x24xf32>
    %64 = tpu.matmul %53, %58, %cst_25 {dimension_numbers = #tpu.dot_dimension_numbers<[2], [2], [1], [1], [0, 0, 0, 1, 1, 1], [0], [0]>} : vector<2x24x32xf32>, vector<2x24x32xf32>, vector<2x24x24xf32> -> vector<2x24x24xf32>
    "tpu.trace_stop"() : () -> ()
    %cst_26 = arith.constant 0.176776692 : f32
    %65 = vector.broadcast %cst_26 : f32 to vector<2x24x24xf32>
    %66 = arith.mulf %64, %65 : vector<2x24x24xf32>
    %cst_27 = arith.constant dense<0xFF800000> : vector<2x24xf32>
    %67 = vector.multi_reduction <maximumf>, %66, %cst_27 [2] : vector<2x24x24xf32> to vector<2x24xf32>
    %68 = vector.shape_cast %67 : vector<2x24xf32> to vector<2x24x1xf32>
    %69 = vector.broadcast %68 : vector<2x24x1xf32> to vector<2x24x24xf32>
    %70 = arith.subf %66, %69 : vector<2x24x24xf32>
    %71 = math.exp %70 : vector<2x24x24xf32>
    %cst_28 = arith.constant dense<0.000000e+00> : vector<2x24xf32>
    %72 = vector.multi_reduction <add>, %71, %cst_28 [2] : vector<2x24x24xf32> to vector<2x24xf32>
    %73 = vector.shape_cast %72 : vector<2x24xf32> to vector<2x24x1xf32>
    %74 = tpu.reciprocal %73 {approx = true} : vector<2x24x1xf32> -> vector<2x24x1xf32>
    %75 = vector.broadcast %74 : vector<2x24x1xf32> to vector<2x24x24xf32>
    %76 = arith.mulf %71, %75 : vector<2x24x24xf32>
    "tpu.trace_start"() <{level = 10 : i32, message = "bqk,bkd->bqd"}> : () -> ()
    %cst_29 = arith.constant dense<0.000000e+00> : vector<2x24x32xf32>
    %77 = tpu.matmul %76, %63, %cst_29 {dimension_numbers = #tpu.dot_dimension_numbers<[2], [1], [1], [2], [0, 0, 0, 1, 1, 2], [0], [0]>} : vector<2x24x24xf32>, vector<2x24x32xf32>, vector<2x24x32xf32> -> vector<2x24x32xf32>
    "tpu.trace_stop"() : () -> ()
    %78 = vector.shape_cast %77 : vector<2x24x32xf32> to vector<48x32xf32>
    %c0_30 = arith.constant 0 : index
    %c96 = arith.constant 96 : index
    %79 = vector.load %arg2[%c0_30, %c96] : memref<32x256xf32, #tpu.memory_space<vmem>>, vector<32x32xf32>
    %cst_31 = arith.constant dense<0.000000e+00> : vector<48x32xf32>
    %80 = tpu.matmul %78, %79, %cst_31 {dimension_numbers = #tpu.dot_dimension_numbers<[1], [0], [0], [1], [0, 0, 1, 1], [], []>} : vector<48x32xf32>, vector<32x32xf32>, vector<48x32xf32> -> vector<48x32xf32>
    %c32 = arith.constant 32 : index
    %c0_32 = arith.constant 0 : index
    %81 = vector.load %arg4[%c32, %c0_32] : memref<48x64xf32, #tpu.memory_space<vmem>>, vector<1x32xf32>
    %82 = vector.broadcast %81 : vector<1x32xf32> to vector<48x32xf32>
    %83 = arith.addf %80, %82 : vector<48x32xf32>
    %84 = arith.addf %46, %83 : vector<48x32xf32>
    %c33 = arith.constant 33 : index
    %c0_33 = arith.constant 0 : index
    %85 = vector.load %arg4[%c33, %c0_33] : memref<48x64xf32, #tpu.memory_space<vmem>>, vector<1x32xf32>
    %c34 = arith.constant 34 : index
    %c0_34 = arith.constant 0 : index
    %86 = vector.load %arg4[%c34, %c0_34] : memref<48x64xf32, #tpu.memory_space<vmem>>, vector<1x32xf32>
    %cst_35 = arith.constant dense<0.000000e+00> : vector<48xf32>
    %87 = vector.multi_reduction <add>, %84, %cst_35 [1] : vector<48x32xf32> to vector<48xf32>
    %88 = vector.shape_cast %87 : vector<48xf32> to vector<48x1xf32>
    %cst_36 = arith.constant 3.200000e+01 : f32
    %89 = vector.broadcast %cst_36 : f32 to vector<48x1xf32>
    %90 = arith.divf %88, %89 : vector<48x1xf32>
    %91 = vector.broadcast %90 : vector<48x1xf32> to vector<48x32xf32>
    %92 = arith.subf %84, %91 : vector<48x32xf32>
    %93 = arith.mulf %92, %92 : vector<48x32xf32>
    %cst_37 = arith.constant dense<0.000000e+00> : vector<48xf32>
    %94 = vector.multi_reduction <add>, %93, %cst_37 [1] : vector<48x32xf32> to vector<48xf32>
    %95 = vector.shape_cast %94 : vector<48xf32> to vector<48x1xf32>
    %cst_38 = arith.constant 3.200000e+01 : f32
    %96 = vector.broadcast %cst_38 : f32 to vector<48x1xf32>
    %97 = arith.divf %95, %96 : vector<48x1xf32>
    %98 = vector.broadcast %90 : vector<48x1xf32> to vector<48x32xf32>
    %99 = arith.subf %84, %98 : vector<48x32xf32>
    %cst_39 = arith.constant 9.99999996E-13 : f32
    %100 = vector.broadcast %cst_39 : f32 to vector<48x1xf32>
    %101 = arith.addf %97, %100 : vector<48x1xf32>
    %102 = math.rsqrt %101 : vector<48x1xf32>
    %103 = vector.broadcast %102 : vector<48x1xf32> to vector<48x32xf32>
    %104 = arith.mulf %99, %103 : vector<48x32xf32>
    %105 = vector.broadcast %85 : vector<1x32xf32> to vector<48x32xf32>
    %106 = arith.mulf %104, %105 : vector<48x32xf32>
    %107 = vector.broadcast %86 : vector<1x32xf32> to vector<48x32xf32>
    %108 = arith.addf %106, %107 : vector<48x32xf32>
    %c0_40 = arith.constant 0 : index
    %c128 = arith.constant 128 : index
    %109 = vector.load %arg2[%c0_40, %c128] : memref<32x256xf32, #tpu.memory_space<vmem>>, vector<32x64xf32>
    %cst_41 = arith.constant dense<0.000000e+00> : vector<48x64xf32>
    %110 = tpu.matmul %108, %109, %cst_41 {dimension_numbers = #tpu.dot_dimension_numbers<[1], [0], [0], [1], [0, 0, 1, 1], [], []>} : vector<48x32xf32>, vector<32x64xf32>, vector<48x64xf32> -> vector<48x64xf32>
    %c35 = arith.constant 35 : index
    %c0_42 = arith.constant 0 : index
    %111 = vector.load %arg4[%c35, %c0_42] : memref<48x64xf32, #tpu.memory_space<vmem>>, vector<1x64xf32>
    %112 = vector.broadcast %111 : vector<1x64xf32> to vector<48x64xf32>
    %113 = arith.addf %110, %112 : vector<48x64xf32>
    %114 = arith.mulf %113, %113 : vector<48x64xf32>
    %115 = arith.mulf %113, %114 : vector<48x64xf32>
    %cst_43 = arith.constant 4.471500e-02 : f32
    %116 = vector.broadcast %cst_43 : f32 to vector<48x64xf32>
    %117 = arith.mulf %116, %115 : vector<48x64xf32>
    %118 = arith.addf %113, %117 : vector<48x64xf32>
    %cst_44 = arith.constant 0.797884583 : f32
    %119 = vector.broadcast %cst_44 : f32 to vector<48x64xf32>
    %120 = arith.mulf %119, %118 : vector<48x64xf32>
    %121 = math.tanh %120 : vector<48x64xf32>
    %cst_45 = arith.constant 1.000000e+00 : f32
    %122 = vector.broadcast %cst_45 : f32 to vector<48x64xf32>
    %123 = arith.addf %122, %121 : vector<48x64xf32>
    %cst_46 = arith.constant 5.000000e-01 : f32
    %124 = vector.broadcast %cst_46 : f32 to vector<48x64xf32>
    %125 = arith.mulf %124, %123 : vector<48x64xf32>
    %126 = arith.mulf %113, %125 : vector<48x64xf32>
    %c0_47 = arith.constant 0 : index
    %c32_48 = arith.constant 32 : index
    %127 = vector.load %arg3[%c0_47, %c32_48] : memref<64x64xf32, #tpu.memory_space<vmem>>, vector<64x32xf32>
    %cst_49 = arith.constant dense<0.000000e+00> : vector<48x32xf32>
    %128 = tpu.matmul %126, %127, %cst_49 {dimension_numbers = #tpu.dot_dimension_numbers<[1], [0], [0], [1], [0, 0, 1, 1], [], []>} : vector<48x64xf32>, vector<64x32xf32>, vector<48x32xf32> -> vector<48x32xf32>
    %c36 = arith.constant 36 : index
    %c0_50 = arith.constant 0 : index
    %129 = vector.load %arg4[%c36, %c0_50] : memref<48x64xf32, #tpu.memory_space<vmem>>, vector<1x32xf32>
    %130 = vector.broadcast %129 : vector<1x32xf32> to vector<48x32xf32>
    %131 = arith.addf %128, %130 : vector<48x32xf32>
    %132 = arith.addf %108, %131 : vector<48x32xf32>
    %c37 = arith.constant 37 : index
    %c0_51 = arith.constant 0 : index
    %133 = vector.load %arg4[%c37, %c0_51] : memref<48x64xf32, #tpu.memory_space<vmem>>, vector<1x32xf32>
    %c38 = arith.constant 38 : index
    %c0_52 = arith.constant 0 : index
    %134 = vector.load %arg4[%c38, %c0_52] : memref<48x64xf32, #tpu.memory_space<vmem>>, vector<1x32xf32>
    %cst_53 = arith.constant dense<0.000000e+00> : vector<48xf32>
    %135 = vector.multi_reduction <add>, %132, %cst_53 [1] : vector<48x32xf32> to vector<48xf32>
    %136 = vector.shape_cast %135 : vector<48xf32> to vector<48x1xf32>
    %cst_54 = arith.constant 3.200000e+01 : f32
    %137 = vector.broadcast %cst_54 : f32 to vector<48x1xf32>
    %138 = arith.divf %136, %137 : vector<48x1xf32>
    %139 = vector.broadcast %138 : vector<48x1xf32> to vector<48x32xf32>
    %140 = arith.subf %132, %139 : vector<48x32xf32>
    %141 = arith.mulf %140, %140 : vector<48x32xf32>
    %cst_55 = arith.constant dense<0.000000e+00> : vector<48xf32>
    %142 = vector.multi_reduction <add>, %141, %cst_55 [1] : vector<48x32xf32> to vector<48xf32>
    %143 = vector.shape_cast %142 : vector<48xf32> to vector<48x1xf32>
    %cst_56 = arith.constant 3.200000e+01 : f32
    %144 = vector.broadcast %cst_56 : f32 to vector<48x1xf32>
    %145 = arith.divf %143, %144 : vector<48x1xf32>
    %146 = vector.broadcast %138 : vector<48x1xf32> to vector<48x32xf32>
    %147 = arith.subf %132, %146 : vector<48x32xf32>
    %cst_57 = arith.constant 9.99999996E-13 : f32
    %148 = vector.broadcast %cst_57 : f32 to vector<48x1xf32>
    %149 = arith.addf %145, %148 : vector<48x1xf32>
    %150 = math.rsqrt %149 : vector<48x1xf32>
    %151 = vector.broadcast %150 : vector<48x1xf32> to vector<48x32xf32>
    %152 = arith.mulf %147, %151 : vector<48x32xf32>
    %153 = vector.broadcast %133 : vector<1x32xf32> to vector<48x32xf32>
    %154 = arith.mulf %152, %153 : vector<48x32xf32>
    %155 = vector.broadcast %134 : vector<1x32xf32> to vector<48x32xf32>
    %156 = arith.addf %154, %155 : vector<48x32xf32>
    %157 = vector.extract_strided_slice %156 {offsets = [0, 0], sizes = [1, 32], strides = [1, 1]} : vector<48x32xf32> to vector<1x32xf32>
    %158 = vector.extract_strided_slice %156 {offsets = [24, 0], sizes = [1, 32], strides = [1, 1]} : vector<48x32xf32> to vector<1x32xf32>
    %159 = tpu.concatenate %157, %158 in 0 : vector<1x32xf32>, vector<1x32xf32> -> vector<2x32xf32>
    %c0_58 = arith.constant 0 : index
    %c192 = arith.constant 192 : index
    %160 = vector.load %arg2[%c0_58, %c192] : memref<32x256xf32, #tpu.memory_space<vmem>>, vector<32x32xf32>
    %cst_59 = arith.constant dense<0.000000e+00> : vector<2x32xf32>
    %161 = tpu.matmul %159, %160, %cst_59 {dimension_numbers = #tpu.dot_dimension_numbers<[1], [0], [0], [1], [0, 0, 1, 1], [], []>} : vector<2x32xf32>, vector<32x32xf32>, vector<2x32xf32> -> vector<2x32xf32>
    %c39 = arith.constant 39 : index
    %c0_60 = arith.constant 0 : index
    %162 = vector.load %arg4[%c39, %c0_60] : memref<48x64xf32, #tpu.memory_space<vmem>>, vector<1x32xf32>
    %163 = vector.broadcast %162 : vector<1x32xf32> to vector<2x32xf32>
    %164 = arith.addf %161, %163 : vector<2x32xf32>
    %165 = math.tanh %164 : vector<2x32xf32>
    %c0_61 = arith.constant 0 : index
    %c224 = arith.constant 224 : index
    %166 = vector.load %arg2[%c0_61, %c224] : memref<32x256xf32, #tpu.memory_space<vmem>>, vector<32x32xf32>
    %cst_62 = arith.constant dense<0.000000e+00> : vector<2x32xf32>
    %167 = tpu.matmul %165, %166, %cst_62 {dimension_numbers = #tpu.dot_dimension_numbers<[1], [0], [0], [1], [0, 0, 1, 1], [], []>} : vector<2x32xf32>, vector<32x32xf32>, vector<2x32xf32> -> vector<2x32xf32>
    %c40 = arith.constant 40 : index
    %c0_63 = arith.constant 0 : index
    %168 = vector.load %arg4[%c40, %c0_63] : memref<48x64xf32, #tpu.memory_space<vmem>>, vector<1x32xf32>
    %169 = vector.broadcast %168 : vector<1x32xf32> to vector<2x32xf32>
    %170 = arith.addf %167, %169 : vector<2x32xf32>
    %171 = vector.extract_strided_slice %170 {offsets = [0, 0], sizes = [2, 2], strides = [1, 1]} : vector<2x32xf32> to vector<2x2xf32>
    %c0_64 = arith.constant 0 : index
    %c0_65 = arith.constant 0 : index
    %c0_66 = arith.constant 0 : index
    %172 = vector.load %arg5[%c0_64, %c0_65, %c0_66] : memref<2x2x2xf32, #tpu.memory_space<vmem>>, vector<1x2x2xf32>
    %173 = vector.shape_cast %172 : vector<1x2x2xf32> to vector<2x2xf32>
    %174 = vector.shape_cast %171 : vector<2x2xf32> to vector<1x2x2xf32>
    tpu.vector_store %arg5[%c0_64, %c0_65, %c0_66], %174 {strides = array<i32>} : memref<2x2x2xf32, #tpu.memory_space<vmem>>, vector<1x2x2xf32>,
    %cst_67 = arith.constant dense<0xFF800000> : vector<2xf32>
    %175 = vector.multi_reduction <maximumf>, %171, %cst_67 [1] : vector<2x2xf32> to vector<2xf32>
    %176 = vector.shape_cast %175 : vector<2xf32> to vector<2x1xf32>
    %177 = vector.broadcast %176 : vector<2x1xf32> to vector<2x2xf32>
    %178 = arith.subf %171, %177 : vector<2x2xf32>
    %179 = math.exp %178 : vector<2x2xf32>
    %cst_68 = arith.constant dense<0.000000e+00> : vector<2xf32>
    %180 = vector.multi_reduction <add>, %179, %cst_68 [1] : vector<2x2xf32> to vector<2xf32>
    %181 = vector.shape_cast %180 : vector<2xf32> to vector<2x1xf32>
    %182 = tpu.reciprocal %181 {approx = true} : vector<2x1xf32> -> vector<2x1xf32>
    %183 = vector.broadcast %182 : vector<2x1xf32> to vector<2x2xf32>
    %184 = arith.mulf %179, %183 : vector<2x2xf32>
    %c1 = arith.constant 1 : index
    %c0_69 = arith.constant 0 : index
    %c0_70 = arith.constant 0 : index
    %185 = vector.load %arg5[%c1, %c0_69, %c0_70] : memref<2x2x2xf32, #tpu.memory_space<vmem>>, vector<1x2x2xf32>
    %186 = vector.shape_cast %185 : vector<1x2x2xf32> to vector<2x2xf32>
    %187 = vector.shape_cast %184 : vector<2x2xf32> to vector<1x2x2xf32>
    tpu.vector_store %arg5[%c1, %c0_69, %c0_70], %187 {strides = array<i32>} : memref<2x2x2xf32, #tpu.memory_space<vmem>>, vector<1x2x2xf32>,
    return
  }
}

</mosaic_0001>

<bundles_post_ra>
// kernel: tpu_custom_call.1
= control target key start
LH: loop header
LB: loop body
LE: loop exit
PB: predicated region body
PF: predicated region fallthrough
CT: control target
= control target key end

     0   :  { %10 = vsyncpa [#allocation3], 0  ;;  %s3041_s0 = inlined_call_operand.hbm [shape: f32[2,16,64], index: 0, kind: input, shape index: {}]   ;;  %s3042_s1 = inlined_call_operand.hbm [shape: f32[2,8,32], index: 1, kind: input, shape index: {}]   ;;  %s3043_s2 = inlined_call_operand.hbm [shape: f32[32,256], index: 2, kind: input, shape index: {}]   ;;  %s3044_s3 = inlined_call_operand.hbm [shape: f32[64,64], index: 3, kind: input, shape index: {}]   ;;  %s3045_s4 = inlined_call_operand.hbm [shape: f32[48,64], index: 4, kind: input, shape index: {}]   ;;  %s3046_s5 = inlined_call_operand.hbm [shape: f32[2,2,2], index: 5, kind: output, shape index: {}]  }
   0x1   :  { %11 = vsyncpa [#allocation6], 0 }
   0x2   :  { %12 = vsyncpa [#allocation9], 0 }
   0x3   :  { %13 = vsyncpa [#allocation4], 0  ;;  %s2528_s18 = smov [#allocation5]   ;;  %s2529_s20 = smov [#allocation8]  }
   0x4   :  { %s31_s19 = sshll.u32 %s2528_s18, 4  ;;  %s55_s21 = sshll.u32 %s2529_s20, 4  ;;  %s32_s19 = int_to_ptr.vmem [resolvable:$true] %s31_s19  ;;  %s2575_s21 = int_to_ptr.vmem [resolvable:$true] %s55_s21 }
   0x5   :  { %s2388_s24 = scalar_lea.hbm %s3042_s1, 256 }
   0x6   :  { %p2389_p0 = scmp.ne.s32.totalorder %s3042_s1, %s2388_s24  ;;  %p2392_p1 = scmp.lt.u32.totalorder %s2388_s24, %s3042_s1 }
   0x8   :  { %p2394_p2 = pnand %p2392_p1, %p2389_p0 }
   0xa   :  { %2397 = shalt.err (!%p2394_p2)
}
   0xb   :  { %s2398_s29 = scalar_lea.vmem %s32_s19, 256  ;;  %p2403_p4 = scmp.lt.s32.totalorder %s32_s19, %s32_s19 }
   0xc   :  { %p2399_p3 = scmp.ne.s32.totalorder %s32_s19, %s2398_s29  ;;  %p2404_p5 = scmp.lt.s32.totalorder %s2398_s29, %s2398_s29 }
   0xe   :  { %p2405_p6 = por %p2404_p5, %p2403_p4 }
  0x10   :  { %p2406_p7 = pnand %p2405_p6, %p2399_p3 }
  0x12   :  { %2409 = shalt.err (!%p2406_p7)
}
  0x13   :  { %s2530_s30 = smov 128   ;;  %s2531_s6 = smov 8  }
  0x14   :  { %37 = dma.hbm_to_vmem [thread:$0]  %s3042_s1, 256, %s32_s19, [#allocation6], %s2530_s30, %s2530_s30, %s2531_s6  }
  0x15   :  { %s2410_s11 = scalar_lea.hbm %s3044_s3, 1024 }
  0x16   :  { %p2411_p8 = scmp.ne.s32.totalorder %s3044_s3, %s2410_s11  ;;  %p2414_p9 = scmp.lt.u32.totalorder %s2410_s11, %s3044_s3 }
  0x18   :  { %p2416_p10 = pnand %p2414_p9, %p2411_p8 }
  0x1a   :  { %2419 = shalt.err (!%p2416_p10)
}
  0x1b   :  { %s2420_s16 = scalar_lea.vmem %s2575_s21, 1024  ;;  %p2425_p12 = scmp.lt.s32.totalorder %s2575_s21, %s2575_s21 }
  0x1c   :  { %p2421_p11 = scmp.ne.s32.totalorder %s2575_s21, %s2420_s16  ;;  %p2426_p13 = scmp.lt.s32.totalorder %s2420_s16, %s2420_s16 }
  0x1e   :  { %p2427_p0 = por %p2426_p13, %p2425_p12 }
  0x20   :  { %p2428_p1 = pnand %p2427_p0, %p2421_p11 }
  0x22   :  { %2431 = shalt.err (!%p2428_p1)
}
  0x23   :  { %61 = dma.hbm_to_vmem [thread:$0]  %s3044_s3, 1024, %s2575_s21, [#allocation9], %s2530_s30, %s2530_s30, %s2531_s6  }
  0x24   :  { %s2532_s18 = smov [#allocation2]   ;;  %s2533_s20 = smov [#allocation7]  }
  0x25   :  { %s19_s19 = sshll.u32 %s2532_s18, 4  ;;  %s43_s22 = sshll.u32 %s2533_s20, 4  ;;  %s20_s19 = int_to_ptr.vmem [resolvable:$true] %s19_s19  ;;  %s2612_s22 = int_to_ptr.vmem [resolvable:$true] %s43_s22 }
  0x26   :  { %s2432_s25 = scalar_lea.hbm %s3041_s0, 512 }
  0x27   :  { %p2433_p2 = scmp.ne.s32.totalorder %s3041_s0, %s2432_s25  ;;  %p2436_p3 = scmp.lt.u32.totalorder %s2432_s25, %s3041_s0 }
  0x29   :  { %p2438_p4 = pnand %p2436_p3, %p2433_p2 }
  0x2b   :  { %2441 = shalt.err (!%p2438_p4)
}
  0x2c   :  { %s2442_s3 = scalar_lea.vmem %s20_s19, 512  ;;  %p2447_p6 = scmp.lt.s32.totalorder %s20_s19, %s20_s19 }
  0x2d   :  { %p2443_p5 = scmp.ne.s32.totalorder %s20_s19, %s2442_s3  ;;  %p2448_p7 = scmp.lt.s32.totalorder %s2442_s3, %s2442_s3 }
  0x2f   :  { %p2449_p8 = por %p2448_p7, %p2447_p6 }
  0x31   :  { %p2450_p9 = pnand %p2449_p8, %p2443_p5 }
  0x33   :  { %2453 = shalt.err (!%p2450_p9)
}
  0x34   :  { %25 = dma.hbm_to_vmem [thread:$0]  %s3041_s0, 512, %s20_s19, [#allocation3], %s2530_s30, %s2530_s30, %s2531_s6  }
  0x35   :  { %s2454_s10 = scalar_lea.hbm %s3043_s2, 1024 }
  0x36   :  { %p2455_p10 = scmp.ne.s32.totalorder %s3043_s2, %s2454_s10  ;;  %p2458_p11 = scmp.lt.u32.totalorder %s2454_s10, %s3043_s2 }
  0x38   :  { %p2460_p12 = pnand %p2458_p11, %p2455_p10 }
  0x3a   :  { %2463 = shalt.err (!%p2460_p12)
}
  0x3b   :  { %s2464_s15 = scalar_lea.vmem %s2612_s22, 1024  ;;  %p2469_p0 = scmp.lt.s32.totalorder %s2612_s22, %s2612_s22 }
  0x3c   :  { %p2465_p13 = scmp.ne.s32.totalorder %s2612_s22, %s2464_s15  ;;  %p2470_p1 = scmp.lt.s32.totalorder %s2464_s15, %s2464_s15 }
  0x3e   :  { %p2471_p2 = por %p2470_p1, %p2469_p0 }
  0x40   :  { %p2472_p3 = pnand %p2471_p2, %p2465_p13 }
  0x42   :  { %2475 = shalt.err (!%p2472_p3)
}
  0x43   :  { %s2534_s0 = smov 256   ;;  %s2535_s16 = smov 16  }
  0x44   :  { %49 = dma.hbm_to_vmem [thread:$0]  %s3043_s2, 1024, %s2612_s22, [#allocation6], %s2534_s0, %s2534_s0, %s2535_s16  }
  0x45   :  { %s2536_s18 = smov [#allocation10]   ;;  %s2476_s24 = scalar_lea.hbm %s3045_s4, 768 }
  0x46   :  { %s67_s19 = sshll.u32 %s2536_s18, 4  ;;  %p2477_p4 = scmp.ne.s32.totalorder %s3045_s4, %s2476_s24  ;;  %s68_s19 = int_to_ptr.vmem [resolvable:$true] %s67_s19 }
  0x47   :  { %p2480_p5 = scmp.lt.u32.totalorder %s2476_s24, %s3045_s4 }
  0x49   :  { %p2482_p6 = pnand %p2480_p5, %p2477_p4 }
  0x4b   :  { %2485 = shalt.err (!%p2482_p6)
}
  0x4c   :  { %s2486_s29 = scalar_lea.vmem %s68_s19, 768  ;;  %p2491_p8 = scmp.lt.s32.totalorder %s68_s19, %s68_s19 }
  0x4d   :  { %p2487_p7 = scmp.ne.s32.totalorder %s68_s19, %s2486_s29  ;;  %p2492_p9 = scmp.lt.s32.totalorder %s2486_s29, %s2486_s29 }
  0x4f   :  { %p2493_p10 = por %p2492_p9, %p2491_p8 }
  0x51   :  { %p2494_p11 = pnand %p2493_p10, %p2487_p7 }
  0x53   :  { %2497 = shalt.err (!%p2494_p11)
}
  0x54   :  { %73 = dma.hbm_to_vmem [thread:$0]  %s3045_s4, 768, %s68_s19, [#allocation9], %s2530_s30, %s2530_s30, %s2531_s6  }
  0x55   :  { %2520 = dma.done.wait [#allocation3], 512  }
  0x56   :  { %2521 = vsyncadd [#allocation3], 4294966784 }
  0x57   :  { %2522 = dma.done.wait [#allocation6], 1280  }
  0x58   :  { %2523 = vsyncadd [#allocation6], 4294966016 }
  0x59   :  { %2524 = dma.done.wait [#allocation9], 1792  }
  0x5a   :  { %2525 = vsyncadd [#allocation9], 4294965504  ;;  %v2661_v0 = vld [vmem:[#allocation8] sm:$0xff]  ;;  %v2663_v1 = vld [vmem:[#allocation8 + $0x8] sm:$0xff]  ;;  %vm108_vm0 = vcmask 523264   ;;  %vm233_vm1 = vcmask 261120  }
  0x5b   :  { %v2665_v2 = vld [vmem:[#allocation8 + $0x10] sm:$0xff]  ;;  %v2149_v3 = vpack.c.bf16 %v2663_v1, %v2661_v0  ;;  %v2669_v4 = vld [vmem:[#allocation8 + $0x18] sm:$0xff]  ;;  %v2673_v6 = vld [vmem:[#allocation8 + $0x20] sm:$0xff]  ;;  %s2537_s4 = smov 32   ;;  %s2539_s30 = smov 96   ;;  %vm2540_vm2 = vmmov 0  }
  0x5c   :  { %v2153_v5 = vpack.c.bf16 %v2669_v4, %v2665_v2  ;;  %v2675_v7 = vld [vmem:[#allocation8 + $0x28] sm:$0xff]  ;;  %v89_v8 = vld [vmem:[#allocation2] sm:$0xff]  ;;  %v2682_v11 = vld [vmem:[#allocation8 + $0x38] sm:$0xff]  ;;  %vm705_vm4 = vcmask 195584   ;;  %s2542_s6 = smov 64   ;;  %vm1593_vm5 = vcmask 1040384  }
  0x5d   :  { %2150 = vmatprep.subr.bf16.mxu0 %v2149_v3  ;;  %1985 = vmatprep.mubr.msk.f32.mxu0 %vm108_vm0, %v89_v8  ;;  %v2157_v9 = vpack.c.bf16 %v2675_v7, %v2673_v6  ;;  %v2680_v10 = vld [vmem:[#allocation8 + $0x30] sm:$0xff]  ;;  %v90_v13 = vld [vmem:[#allocation2 + $0x8] sm:$0xff]  ;;  %v91_v14 = vld [vmem:[#allocation2 + $0x10] sm:$0xff]  ;;  %vm1780_vm6 = vcmask 9216   ;;  %s2543_s3 = smov [#allocation11]  }
  0x5e   :  { %2152 = vmatpush3.bf16.msra.mxu0 %v2149_v3  ;;  %v2161_v12 = vpack.c.bf16 %v2682_v11, %v2680_v10  ;;  %v92_v15 = vld [vmem:[#allocation2 + $0x18] sm:$0xff]  ;;  %v93_v16 = vld [vmem:[#allocation5] sm:$0xff]  ;;  %v1820_v17 = vld [vmem:[#allocation10 + $0x1a] ss:$0 sm:$0xff]  ;;  %s1800_s21 = sshll.u32 %s2543_s3, 4  ;;  %s1801_s21 = int_to_ptr.vmem [resolvable:$true] %s1800_s21 }
  0x5f   :  { %2154 = vmatprep.subr.bf16.mxu0 %v2153_v5  ;;  %v220_v18 = vadd.f32 %v1820_v17, %v93_v16  ;;  %v224_v19 = vld [vmem:[#allocation10 + $0x10] sm:$0xff]  ;;  %v94_v22 = vld [vmem:[#allocation5 + $0x8] sm:$0xff]  ;;  %v222_v31 = vld [vmem:[#allocation10] sm:$0xff]  ;;  %s2498_s7 = scalar_lea.vmem %s1801_s21, 64  ;;  %p2503_p13 = scmp.lt.s32.totalorder %s1801_s21, %s1801_s21 }
  0x60   :  { %v221_v23 = vadd.f32 %v1820_v17, %v94_v22  ;;  %v1814_v25 = vld [vmem:[#allocation10 + $0x18] ss:$0 sm:$0xff]  ;;  %v1819_v28 = vld [vmem:[#allocation10 + $0x19] ss:$0 sm:$0xff]  ;;  %v223_v37 = vld [vmem:[#allocation10 + $0x8] sm:$0xff]  ;;  %p2499_p12 = scmp.ne.s32.totalorder %s1801_s21, %s2498_s7  ;;  %p2504_p0 = scmp.lt.s32.totalorder %s2498_s7, %s2498_s7 }
  0x61   :  { %v227_v20 = vadd.f32 %v224_v19, %v220_v18  ;;  %vm2175_vm3 = vmpackc.low %vm233_vm1, %vm233_vm1 }
  0x62   :  { %2156 = vmatpush3.bf16.msra.mxu0 %v2153_v5  ;;  %v230_v24 = vadd.f32 %v224_v19, %v221_v23  ;;  %p2505_p1 = por %p2504_p0, %p2503_p13 }
  0x63   :  { %2158 = vmatprep.subr.bf16.mxu0 %v2157_v9  ;;  %v240_v21 = vsel %vm233_vm1, %v227_v20, 0.0 }
  0x64   :  { %241 = vadd.xlane.f32.xlu1 %v240_v21  ;;  %v249_v49 = vsel %vm233_vm1, %v230_v24, 0.0  ;;  %p2506_p2 = pnand %p2505_p1, %p2499_p12 }
  0x66   :  { %2160 = vmatpush3.bf16.msra.mxu0 %v2157_v9 }
  0x67   :  { %2162 = vmatprep.subr.bf16.mxu0 %v2161_v12 }
  0x6a   :  { %2164 = vmatpush3.bf16.msra.mxu0 %v2161_v12 }
  0x6d   :  { %1986 = vmatmul.mubr.msk.f32.vlgmr.msra.gmra.mrb[0].mxu0 %vm108_vm0, %v90_v13 }
  0x6e   :  { %1988 = vmatprep.mubr.msk.f32.mxu0 %vm108_vm0, %v91_v14 }
  0x71   :  { %1989 = vmatmul.mubr.msk.f32.gmra.mrb[2].mxu0 %vm108_vm0, %v92_v15 }
  0xf1   :  { %v242_v50 = vpop.xlane.xlu1 %241 }
  0xf2   :  { %v255_v51 = vmul.f32 0.03125, %v242_v50  ;;  %v1821_v50 = vld [vmem:[#allocation10 + $0x1b] ss:$0 sm:$0xff] }
  0xf4   :  { %v2695_v53 = vsub.f32 %v227_v20, %v255_v51 }
  0xf6   :  { %v267_v61 = vmul.f32 %v2695_v53, %v2695_v53 }
  0xf8   :  { %v277_v13 = vsel %vm233_vm1, %v267_v61, 0.0 }
 0x140   :  { %v1987_v26 = vpop.f32.mrb[0].mxu0 }
 0x141   :  { %v193_v27 = vadd.f32 %v1987_v26, %v1814_v25  ;;  %v187_v29 = vpop.f32.mrb[1].mxu0 }
 0x142   :  { %v188_v30 = vadd.f32 %v1814_v25, %v187_v29 }
 0x143   :  { %v212_v32 = vadd.f32 %v1819_v28, %v193_v27  ;;  %v2731_v27 = vld [vmem:[#allocation7 + $0x20] sm:$0xff] }
 0x144   :  { %v211_v33 = vadd.f32 %v1819_v28, %v188_v30  ;;  %v1990_v34 = vpop.f32.mrb[2].mxu0  ;;  %v1830_v30 = vld [vmem:[#allocation10 + $0x1e] ss:$0 sm:$0xff] }
 0x145   :  { %v203_v35 = vadd.f32 %v1990_v34, %v1814_v25  ;;  %v197_v36 = vpop.f32.mrb[3].mxu0  ;;  %v226_v43 = vadd.f32 %v223_v37, %v212_v32 }
 0x146   :  { %v198_v38 = vadd.f32 %v1814_v25, %v197_v36  ;;  %v225_v39 = vadd.f32 %v222_v31, %v211_v33  ;;  %v2727_v25 = vld [vmem:[#allocation7 + $0x10] sm:$0xff] }
 0x147   :  { %v214_v40 = vadd.f32 %v1819_v28, %v203_v35  ;;  %v237_v47 = vsel %vm233_vm1, %v226_v43, 0.0 }
 0x148   :  { %v213_v41 = vadd.f32 %v1819_v28, %v198_v38  ;;  %v234_v42 = vsel %vm233_vm1, %v225_v39, 0.0  ;;  %v2733_v28 = vld [vmem:[#allocation7 + $0x30] sm:$0xff] }
 0x149   :  { %235 = vadd.xlane.f32.xlu0 %v234_v42  ;;  %v229_v45 = vadd.f32 %v223_v37, %v214_v40  ;;  %v2169_v29 = vpack.c.bf16 %v2733_v28, %v2731_v27 }
 0x14a   :  { %v228_v44 = vadd.f32 %v222_v31, %v213_v41 }
 0x14b   :  { %v246_v48 = vsel %vm233_vm1, %v229_v45, 0.0 }
 0x14c   :  { %v243_v46 = vsel %vm233_vm1, %v228_v44, 0.0 }
 0x14d   :  { %244 = vadd.xlane.f32.xlu1 %v243_v46  ;;  %238 = vadd.xlane.f32.xlu0 %v237_v47 }
 0x151   :  { %247 = vadd.xlane.f32.xlu0 %v246_v48  ;;  %250 = vadd.xlane.f32.xlu1 %v249_v49 }
 0x1d6   :  { %v236_v52 = vpop.xlane.xlu0 %235 }
 0x1d7   :  { %v253_v54 = vmul.f32 0.03125, %v236_v52  ;;  %v1822_v52 = vld [vmem:[#allocation10 + $0x1c] ss:$0 sm:$0xff] }
 0x1d9   :  { %v2697_v55 = vsub.f32 %v225_v39, %v253_v54 }
 0x1da   :  { %v245_v56 = vpop.xlane.xlu1 %244  ;;  %v239_v57 = vpop.xlane.xlu0 %238 }
 0x1db   :  { %v256_v58 = vmul.f32 0.03125, %v245_v56  ;;  %v254_v59 = vmul.f32 0.03125, %v239_v57  ;;  %v265_v60 = vmul.f32 %v2697_v55, %v2697_v55 }
 0x1dd   :  { %v2703_v62 = vsub.f32 %v228_v44, %v256_v58  ;;  %v2705_v63 = vsub.f32 %v226_v43, %v254_v59  ;;  %v271_v3 = vsel %vm233_vm1, %v265_v60, 0.0 }
 0x1de   :  { %272 = vadd.xlane.f32.xlu0 %v271_v3  ;;  %v248_v5 = vpop.xlane.xlu0 %247  ;;  %v251_v8 = vpop.xlane.xlu1 %250 }
 0x1df   :  { %v257_v9 = vmul.f32 0.03125, %v248_v5  ;;  %v258_v12 = vmul.f32 0.03125, %v251_v8  ;;  %v266_v14 = vmul.f32 %v2705_v63, %v2705_v63  ;;  %v268_v18 = vmul.f32 %v2703_v62, %v2703_v62 }
 0x1e1   :  { %v2711_v15 = vsub.f32 %v229_v45, %v257_v9  ;;  %v2713_v16 = vsub.f32 %v230_v24, %v258_v12  ;;  %v274_v17 = vsel %vm233_vm1, %v266_v14, 0.0  ;;  %v280_v21 = vsel %vm233_vm1, %v268_v18, 0.0  ;;  %v2725_v24 = vld [vmem:[#allocation7] sm:$0xff] }
 0x1e2   :  { %278 = vadd.xlane.f32.xlu0 %v277_v13  ;;  %275 = vadd.xlane.f32.xlu1 %v274_v17  ;;  %v2165_v26 = vpack.c.bf16 %v2727_v25, %v2725_v24 }
 0x1e3   :  { %v269_v19 = vmul.f32 %v2711_v15, %v2711_v15  ;;  %v270_v20 = vmul.f32 %v2713_v16, %v2713_v16 }
 0x1e4   :  { %2166 = vmatprep.subr.bf16.mxu1 %v2165_v26 }
 0x1e5   :  { %v283_v22 = vsel %vm233_vm1, %v269_v19, 0.0  ;;  %v286_v23 = vsel %vm233_vm1, %v270_v20, 0.0  ;;  %2168 = vmatpush3.bf16.msra.mxu1 %v2165_v26  ;;  %v2538_v20 = vmov 0.0|0.0  }
 0x1e6   :  { %281 = vadd.xlane.f32.xlu1 %v280_v21  ;;  %284 = vadd.xlane.f32.xlu0 %v283_v22 }
 0x1e7   :  { %2170 = vmatprep.subr.bf16.mxu1 %v2169_v29  ;;  %2177 = vmatprep.subr.bf16.mxu0 %v2538_v20 }
 0x1e9   :  { %2172 = vmatpush3.bf16.msra.mxu1 %v2169_v29 }
 0x1ea   :  { %287 = vadd.xlane.f32.xlu1 %v286_v23  ;;  %2173 = vmatprep.subr.bf16.mxu1 %v2538_v20 }
 0x1fc   :  { %467 = vrot.lane.b32.xlu0 %v1830_v30, %s2537_s4 }
 0x26b   :  { %v273_v31 = vpop.xlane.xlu0 %272 }
 0x26c   :  { %v289_v32 = vmul.f32 0.03125, %v273_v31 }
 0x26e   :  { %v295_v33 = vadd.f32 1e-12, %v289_v32  ;;  %v2541_v32 = vmov 0.0  }
 0x26f   :  { %v276_v34 = vpop.xlane.xlu1 %275  ;;  %v279_v35 = vpop.xlane.xlu0 %278  ;;  %2029 = vmatprep.mubr.msk.f32.mxu0 %vm2540_vm2, %v2541_v32 }
 0x270   :  { %2318 = vrsqrt.f32 %v295_v33  ;;  %v290_v36 = vmul.f32 0.03125, %v276_v34  ;;  %v291_v37 = vmul.f32 0.03125, %v279_v35 }
 0x272   :  { %v296_v38 = vadd.f32 1e-12, %v290_v36  ;;  %v297_v39 = vadd.f32 1e-12, %v291_v37 }
 0x273   :  { %v282_v40 = vpop.xlane.xlu1 %281  ;;  %v285_v41 = vpop.xlane.xlu0 %284 }
 0x274   :  { %2320 = vrsqrt.f32 %v296_v38  ;;  %v292_v42 = vmul.f32 0.03125, %v282_v40  ;;  %v293_v43 = vmul.f32 0.03125, %v285_v41 }
 0x275   :  { %2322 = vrsqrt.f32 %v297_v39 }
 0x276   :  { %v298_v44 = vadd.f32 1e-12, %v292_v42  ;;  %v299_v45 = vadd.f32 1e-12, %v293_v43 }
 0x277   :  { %v288_v46 = vpop.xlane.xlu1 %287 }
 0x278   :  { %2324 = vrsqrt.f32 %v298_v44  ;;  %v294_v47 = vmul.f32 0.03125, %v288_v46 }
 0x279   :  { %2326 = vrsqrt.f32 %v299_v45 }
 0x27a   :  { %v2319_v48 = vpop.eup %2318  ;;  %v300_v49 = vadd.f32 1e-12, %v294_v47  ;;  %v1829_v47 = vld [vmem:[#allocation10 + $0x1d] ss:$0 sm:$0xff] }
 0x27b   :  { %v307_v51 = vmul.f32 %v2319_v48, %v2697_v55 }
 0x27c   :  { %2328 = vrsqrt.f32 %v300_v49 }
 0x27d   :  { %v317_v54 = vmul.f32 %v1821_v50, %v307_v51 }
 0x27e   :  { %v2321_v56 = vpop.eup %2320 }
 0x27f   :  { %v2323_v57 = vpop.eup %2322  ;;  %v2739_v58 = vadd.f32 %v1822_v52, %v317_v54  ;;  %v308_v59 = vmul.f32 %v2321_v56, %v2705_v63 }
 0x280   :  { %v309_v60 = vmul.f32 %v2323_v57, %v2695_v53 }
 0x281   :  { %1999 = vmatprep.mubr.msk.f32.mxu1 %vm233_vm1, %v2739_v58  ;;  %v318_v61 = vmul.f32 %v1821_v50, %v308_v59 }
 0x282   :  { %v2325_v3 = vpop.eup %2324  ;;  %v319_v5 = vmul.f32 %v1821_v50, %v309_v60 }
 0x283   :  { %v2327_v8 = vpop.eup %2326  ;;  %v2745_v9 = vadd.f32 %v1822_v52, %v318_v61  ;;  %v310_v55 = vmul.f32 %v2325_v3, %v2703_v62 }
 0x284   :  { %v2748_v12 = vadd.f32 %v1822_v52, %v319_v5  ;;  %v311_v13 = vmul.f32 %v2327_v8, %v2711_v15 }
 0x285   :  { %2000 = vmatmul.mubr.msk.f32.vlgmr.msra.gmra.mrb[0].mxu1 %vm233_vm1, %v2745_v9  ;;  %v320_v63 = vmul.f32 %v1821_v50, %v310_v55 }
 0x286   :  { %v2329_v53 = vpop.eup %2328  ;;  %2002 = vmatprep.mubr.msk.f32.mxu1 %vm233_vm1, %v2748_v12  ;;  %v321_v14 = vmul.f32 %v1821_v50, %v311_v13 }
 0x287   :  { %v2755_v17 = vadd.f32 %v1822_v52, %v320_v63  ;;  %v312_v18 = vmul.f32 %v2329_v53, %v2713_v16  ;;  %v468_v16 = vpop.permute.xlu0 %467 }
 0x288   :  { %v2758_v19 = vadd.f32 %v1822_v52, %v321_v14 }
 0x289   :  { %2003 = vmatmul.mubr.msk.f32.gmra.mrb[2].mxu1 %vm233_vm1, %v2755_v17  ;;  %v322_v62 = vmul.f32 %v1821_v50, %v312_v18 }
 0x28a   :  { %2005 = vmatprep.mubr.msk.f32.mxu1 %vm233_vm1, %v2758_v19 }
 0x28b   :  { %v2764_v15 = vadd.f32 %v1822_v52, %v322_v62 }
 0x28d   :  { %2006 = vmatmul.mubr.msk.f32.gmra.mrb[4].mxu1 %vm233_vm1, %v2764_v15 }
 0x28e   :  { %2014 = vmatprep.mubr.msk.f32.mxu1 %vm2540_vm2, %v2541_v32 }
 0x358   :  { %v2770_v21 = vpop.f32.mrb[0].mxu1 }
 0x359   :  { %v2772_v22 = vpop.f32.mrb[1].mxu1  ;;  %v471_v23 = vadd.f32 %v2770_v21, %v468_v16  ;;  %v456_v51 = vadd.f32 %v2770_v21, %v1829_v47 }
 0x35a   :  { %v470_v26 = vadd.f32 %v468_v16, %v2772_v22  ;;  %v455_v50 = vadd.f32 %v1829_v47, %v2772_v22 }
 0x35c   :  { %v2776_v29 = vpop.f32.mrb[2].mxu1  ;;  %v2248_v30 = vpack.i.bf16 %v471_v23, %v470_v26 }
 0x35d   :  { %v2778_v31 = vpop.f32.mrb[3].mxu1  ;;  %v473_v36 = vadd.f32 %v2776_v29, %v468_v16  ;;  %v458_v54 = vadd.f32 %v2776_v29, %v1829_v47 }
 0x35e   :  { %2249 = vrot.lane.b32.xlu1 %v2248_v30, %s2539_s30  ;;  %v472_v39 = vadd.f32 %v468_v16, %v2778_v31  ;;  %v457_v56 = vadd.f32 %v1829_v47, %v2778_v31 }
 0x360   :  { %v2785_v33 = vpop.f32.mrb[4].mxu1 }
 0x361   :  { %v475_v34 = vadd.f32 %v2785_v33, %v468_v16  ;;  %v2788_v35 = vpop.f32.mrb[5].mxu1  ;;  %v460_v59 = vadd.f32 %v2785_v33, %v1829_v47 }
 0x362   :  { %v474_v37 = vadd.f32 %v468_v16, %v2788_v35  ;;  %v459_v57 = vadd.f32 %v1829_v47, %v2788_v35 }
 0x363   :  { %602 = vrot.lane.b32.xlu0 %v475_v34, %s2539_s30 }
 0x364   :  { %v2253_v38 = vpack.i.bf16 %v474_v37, %v473_v36 }
 0x366   :  { %2254 = vrot.lane.b32.xlu1 %v2253_v38, %s2539_s30 }
 0x36a   :  { %498 = vrot.lane.b32.xlu1 %v472_v39, %s2539_s30  ;;  %v1831_v39 = vld [vmem:[#allocation10 + $0x1f] ss:$0 sm:$0xff] }
 0x3d0   :  { %v2250_v40 = vpop.permute.xlu1 %2249 }
 0x3d1   :  { %v2252_v41 = vunpack.i.h.bf16 %v2250_v40  ;;  %v2251_v42 = vunpack.i.l.bf16 %v2250_v40 }
 0x3d3   :  { %v2174_v43 = vpack.c.bf16 %v2252_v41, %v2251_v42 }
 0x3d5   :  { %2176 = vmatpush3.bf16.xpose.msk.msra.mxu1 %vm2175_vm3, %v2174_v43  ;;  %v603_v52 = vpop.permute.xlu0 %602 }
 0x3d6   :  { %2012 = vmatprep.subr.mxu1 %v2541_v32 }
 0x3d8   :  { %v2255_v44 = vpop.permute.xlu1 %2254 }
 0x3d9   :  { %v2257_v45 = vunpack.i.h.bf16 %v2255_v44  ;;  %v2256_v46 = vunpack.i.l.bf16 %v2255_v44 }
 0x3db   :  { %v2178_v48 = vpack.c.bf16 %v2257_v45, %v2256_v46 }
 0x3dc   :  { %v499_v49 = vpop.permute.xlu1 %498 }
 0x3dd   :  { %2013 = vmatpush3.xpose.msk.msra.mxu1 %vm233_vm1, %v499_v49  ;;  %2180 = vmatpush3.bf16.xpose.msk.msra.mxu0 %vm2175_vm3, %v2178_v48 }
 0x3de   :  { %2027 = vmatprep.subr.mxu0 %v2541_v32  ;;  %2181 = vmatprep.subr.bf16.mxu1 %v2538_v20 }
 0x3e0   :  { %2015 = vmatmul.mubr.msk.f32.vlgmr.msra.gmra.mrb[6].mxu1 %vm233_vm1, %v455_v50 }
 0x3e1   :  { %2017 = vmatprep.mubr.msk.f32.mxu1 %vm2540_vm2, %v2541_v32 }
 0x3e4   :  { %2018 = vmatmul.mubr.msk.f32.gmra.mrb[8].mxu1 %vm233_vm1, %v456_v51 }
 0x3e5   :  { %2028 = vmatpush3.xpose.msk.msra.mxu0 %vm233_vm1, %v603_v52  ;;  %2020 = vmatprep.mubr.msk.f32.mxu1 %vm2540_vm2, %v2541_v32 }
 0x3e6   :  { %2184 = vmatprep.subr.bf16.mxu0 %v2538_v20 }
 0x3e8   :  { %2021 = vmatmul.mubr.msk.f32.gmra.mrb[10].mxu1 %vm233_vm1, %v457_v56  ;;  %2030 = vmatmul.mubr.msk.f32.vlgmr.msra.gmra.mrb[4].mxu0 %vm233_vm1, %v458_v54 }
 0x3e9   :  { %2032 = vmatprep.mubr.msk.f32.mxu0 %vm2540_vm2, %v2541_v32  ;;  %2044 = vmatprep.mubr.msk.f32.mxu1 %vm2540_vm2, %v2541_v32 }
 0x3ec   :  { %2033 = vmatmul.mubr.msk.f32.gmra.mrb[6].mxu0 %vm233_vm1, %v459_v57 }
 0x3ed   :  { %2035 = vmatprep.mubr.msk.f32.mxu0 %vm2540_vm2, %v2541_v32 }
 0x3f0   :  { %2036 = vmatmul.mubr.msk.f32.gmra.mrb[8].mxu0 %vm233_vm1, %v460_v59 }
 0x3f1   :  { %2059 = vmatprep.mubr.msk.f32.mxu0 %vm2540_vm2, %v2541_v32 }
 0x4b3   :  { %v581_v60 = vpop.f32.mrb[6].mxu1 }
 0x4b4   :  { %v699_v61 = vmul.f32 0.17677669, %v581_v60  ;;  %v2016_v3 = vpop.f32.mrb[7].mxu1 }
 0x4b6   :  { %v706_v5 = vsel %vm705_vm4, %v699_v61, -inf }
 0x4b7   :  { %707 = vmax.xlane.f32.xlu1 %v706_v5  ;;  %v586_v8 = vpop.f32.mrb[8].mxu1 }
 0x4b8   :  { %v700_v55 = vmul.f32 0.17677669, %v586_v8  ;;  %v2019_v13 = vpop.f32.mrb[9].mxu1  ;;  %v2273_v8 = vpack.i.bf16 %v2733_v28, %v2731_v27 }
 0x4ba   :  { %v709_v63 = vsel %vm705_vm4, %v700_v55, -inf }
 0x4bb   :  { %v685_v53 = vpop.f32.mrb[4].mxu0  ;;  %710 = vmax.xlane.f32.xlu0 %v709_v63  ;;  %v591_v14 = vpop.f32.mrb[10].mxu1 }
 0x4bc   :  { %v701_v18 = vmul.f32 0.17677669, %v591_v14  ;;  %v2022_v62 = vpop.f32.mrb[11].mxu1  ;;  %v2031_v16 = vpop.f32.mrb[5].mxu0  ;;  %v702_v23 = vmul.f32 0.17677669, %v685_v53 }
 0x4be   :  { %v712_v26 = vsel %vm705_vm4, %v701_v18, -inf  ;;  %v715_v36 = vsel %vm705_vm4, %v702_v23, -inf }
 0x4bf   :  { %v690_v30 = vpop.f32.mrb[6].mxu0  ;;  %713 = vmax.xlane.f32.xlu0 %v712_v26 }
 0x4c0   :  { %v2034_v34 = vpop.f32.mrb[7].mxu0 }
 0x4c3   :  { %v695_v37 = vpop.f32.mrb[8].mxu0  ;;  %716 = vmax.xlane.f32.xlu0 %v715_v36 }
 0x4c4   :  { %v2037_v38 = vpop.f32.mrb[9].mxu0  ;;  %v2857_v27 = vmul.f32 0.17677669, %v695_v37 }
 0x4c6   :  { %v721_v28 = vsel %vm705_vm4, %v2857_v27, -inf }
 0x4c8   :  { %482 = vrot.lane.b32.xlu1 %v1831_v39, %s2542_s6 }
 0x544   :  { %v708_v40 = vpop.xlane.xlu1 %707 }
 0x545   :  { %v724_v41 = vsub.f32 %v699_v61, %v708_v40  ;;  %v2268_v61 = vpack.i.bf16 %v2727_v25, %v2725_v24  ;;  %v2853_v25 = vmul.f32 0.17677669, %v690_v30 }
 0x547   :  { %v730_v42 = vmul.f32 1.442695, %v724_v41  ;;  %v718_v53 = vsel %vm705_vm4, %v2853_v25, -inf }
 0x548   :  { %v483_v43 = vpop.permute.xlu1 %482  ;;  %v711_v44 = vpop.xlane.xlu0 %710 }
 0x549   :  { %2330 = vpow2.f32 %v730_v42  ;;  %v725_v45 = vsub.f32 %v700_v55, %v711_v44  ;;  %v485_v46 = vadd.f32 %v483_v43, %v2772_v22  ;;  %v486_v47 = vadd.f32 %v2770_v21, %v483_v43 }
 0x54a   :  { %v488_v48 = vadd.f32 %v2776_v29, %v483_v43  ;;  %v489_v49 = vadd.f32 %v483_v43, %v2788_v35  ;;  %v490_v29 = vadd.f32 %v2785_v33, %v483_v43  ;;  %v487_v24 = vadd.f32 %v483_v43, %v2778_v31 }
 0x54b   :  { %v732_v50 = vmul.f32 1.442695, %v725_v45  ;;  %v2258_v51 = vpack.i.bf16 %v486_v47, %v485_v46 }
 0x54c   :  { %v714_v52 = vpop.xlane.xlu0 %713  ;;  %v2263_v54 = vpack.i.bf16 %v489_v49, %v488_v48 }
 0x54d   :  { %2332 = vpow2.f32 %v732_v50  ;;  %v726_v56 = vsub.f32 %v701_v18, %v714_v52  ;;  %2259 = vrot.lane.b32.xlu1 %v2258_v51, %s2542_s6 }
 0x54f   :  { %v734_v57 = vmul.f32 1.442695, %v726_v56 }
 0x550   :  { %v717_v59 = vpop.xlane.xlu0 %716 }
 0x551   :  { %2334 = vpow2.f32 %v734_v57  ;;  %v727_v60 = vsub.f32 %v702_v23, %v717_v59  ;;  %2264 = vrot.lane.b32.xlu1 %v2263_v54, %s2542_s6 }
 0x553   :  { %v2331_v22 = vpop.eup %2330  ;;  %v736_v21 = vmul.f32 1.442695, %v727_v60 }
 0x554   :  { %v742_v35 = vsel %vm705_vm4, %v2331_v22, 0.0 }
 0x555   :  { %2336 = vpow2.f32 %v736_v21  ;;  %880 = vrot.lane.b32.xlu1 %v490_v29, %s2542_s6  ;;  %743 = vadd.xlane.f32.xlu0 %v742_v35 }
 0x557   :  { %v2333_v3 = vpop.eup %2332 }
 0x558   :  { %v745_v5 = vsel %vm705_vm4, %v2333_v3, 0.0 }
 0x559   :  { %2269 = vrot.lane.b32.xlu1 %v2268_v61, %s2537_s4  ;;  %746 = vadd.xlane.f32.xlu0 %v745_v5 }
 0x55b   :  { %v2335_v55 = vpop.eup %2334 }
 0x55c   :  { %v748_v33 = vsel %vm705_vm4, %v2335_v55, 0.0 }
 0x55d   :  { %2274 = vrot.lane.b32.xlu1 %v2273_v8, %s2537_s4  ;;  %749 = vadd.xlane.f32.xlu0 %v748_v33 }
 0x55f   :  { %v2337_v13 = vpop.eup %2336 }
 0x560   :  { %v751_v63 = vsel %vm705_vm4, %v2337_v13, 0.0 }
 0x561   :  { %752 = vadd.xlane.f32.xlu0 %v751_v63 }
 0x577   :  { %779 = vrot.lane.b32.xlu0 %v487_v24, %s2542_s6 }
 0x581   :  { %719 = vmax.xlane.f32.xlu1 %v718_v53 }
 0x596   :  { %722 = vmax.xlane.f32.xlu0 %v721_v28 }
 0x5bf   :  { %v2260_v14 = vpop.permute.xlu1 %2259 }
 0x5c0   :  { %v2262_v18 = vunpack.i.h.bf16 %v2260_v14  ;;  %v2261_v62 = vunpack.i.l.bf16 %v2260_v14 }
 0x5c2   :  { %v2182_v16 = vpack.c.bf16 %v2262_v18, %v2261_v62 }
 0x5c3   :  { %v2265_v23 = vpop.permute.xlu1 %2264 }
 0x5c4   :  { %v2267_v31 = vunpack.i.h.bf16 %v2265_v23  ;;  %v2266_v26 = vunpack.i.l.bf16 %v2265_v23  ;;  %2183 = vmatpush3.bf16.msra.mxu1 %v2182_v16 }
 0x5c5   :  { %2042 = vmatprep.subr.mxu1 %v2541_v32 }
 0x5c6   :  { %v2185_v30 = vpack.c.bf16 %v2267_v31, %v2266_v26 }
 0x5c7   :  { %v881_v34 = vpop.permute.xlu1 %880 }
 0x5c8   :  { %2186 = vmatpush3.bf16.msra.mxu0 %v2185_v30 }
 0x5c9   :  { %2057 = vmatprep.subr.mxu0 %v2541_v32 }
 0x5cb   :  { %v2270_v38 = vpop.permute.xlu1 %2269 }
 0x5cc   :  { %2058 = vmatpush3.msra.mxu0 %v881_v34  ;;  %v2272_v40 = vunpack.i.h.bf16 %v2270_v38  ;;  %v2271_v41 = vunpack.i.l.bf16 %v2270_v38 }
 0x5ce   :  { %v2187_v47 = vpack.c.bf16 %v2272_v40, %v2271_v41 }
 0x5cf   :  { %v2275_v42 = vpop.permute.xlu1 %2274 }
 0x5d0   :  { %v2277_v44 = vunpack.i.h.bf16 %v2275_v42  ;;  %v2276_v45 = vunpack.i.l.bf16 %v2275_v42 }
 0x5d2   :  { %v2191_v50 = vpack.c.bf16 %v2277_v44, %v2276_v45 }
 0x5e2   :  { %v744_v36 = vpop.xlane.xlu0 %743 }
 0x5e3   :  { %2338 = vrcp.f32 %v744_v36 }
 0x5e6   :  { %v747_v37 = vpop.xlane.xlu0 %746 }
 0x5e7   :  { %2340 = vrcp.f32 %v747_v37 }
 0x5ea   :  { %v750_v39 = vpop.xlane.xlu0 %749 }
 0x5eb   :  { %2342 = vrcp.f32 %v750_v39 }
 0x5ed   :  { %v2339_v46 = vpop.eup %2338 }
 0x5ee   :  { %v753_v43 = vpop.xlane.xlu0 %752  ;;  %v766_v48 = vmul.f32 %v2339_v46, %v2331_v22 }
 0x5ef   :  { %2344 = vrcp.f32 %v753_v43 }
 0x5f1   :  { %v2341_v51 = vpop.eup %2340 }
 0x5f2   :  { %v780_v49 = vpop.permute.xlu0 %779  ;;  %v767_v52 = vmul.f32 %v2341_v51, %v2333_v3 }
 0x5f3   :  { %2043 = vmatpush3.msra.mxu1 %v780_v49 }
 0x5f4   :  { %2045 = vmatmul.mubr.msk.f32.vlgmr.msra.gmra.mrb[12].mxu1 %vm705_vm4, %v766_v48  ;;  %2188 = vmatprep.subr.bf16.mxu1 %v2187_v47 }
 0x5f5   :  { %2047 = vmatprep.mubr.msk.f32.mxu1 %vm2540_vm2, %v2541_v32  ;;  %2190 = vmatpush3.bf16.msra.mxu1 %v2187_v47  ;;  %v2343_v54 = vpop.eup %2342 }
 0x5f6   :  { %2192 = vmatprep.subr.bf16.mxu1 %v2191_v50  ;;  %v768_v59 = vmul.f32 %v2343_v54, %v2335_v55 }
 0x5f8   :  { %2048 = vmatmul.mubr.msk.f32.gmra.mrb[14].mxu1 %vm705_vm4, %v767_v52 }
 0x5f9   :  { %v2345_v56 = vpop.eup %2344  ;;  %2050 = vmatprep.mubr.msk.f32.mxu1 %vm2540_vm2, %v2541_v32  ;;  %2194 = vmatpush3.bf16.msra.mxu1 %v2191_v50 }
 0x5fa   :  { %v769_v57 = vmul.f32 %v2345_v56, %v2337_v13  ;;  %v2878_v13 = vld [vmem:[#allocation10 + $0x20] ss:$0 sm:$0xff] }
 0x5fc   :  { %2051 = vmatmul.mubr.msk.f32.gmra.mrb[16].mxu1 %vm705_vm4, %v768_v59  ;;  %2060 = vmatmul.mubr.msk.f32.vlgmr.msra.gmra.mrb[10].mxu0 %vm705_vm4, %v769_v57 }
 0x5fd   :  { %2062 = vmatprep.mubr.msk.f32.mxu0 %vm2540_vm2, %v2541_v32 }
 0x60e   :  { %v720_v8 = vpop.xlane.xlu1 %719 }
 0x60f   :  { %v728_v55 = vsub.f32 %v2853_v25, %v720_v8 }
 0x611   :  { %v738_v33 = vmul.f32 1.442695, %v728_v55  ;;  %v2924_v55 = vld [vmem:[#allocation7 + $0x28] sm:$0xff] }
 0x613   :  { %2346 = vpow2.f32 %v738_v33  ;;  %v2926_v33 = vld [vmem:[#allocation7 + $0x38] sm:$0xff] }
 0x61d   :  { %v2347_v36 = vpop.eup %2346 }
 0x61e   :  { %v754_v37 = vsel %vm705_vm4, %v2347_v36, 0.0 }
 0x623   :  { %v723_v38 = vpop.xlane.xlu0 %722 }
 0x624   :  { %v729_v39 = vsub.f32 %v2857_v27, %v723_v38 }
 0x626   :  { %v740_v40 = vmul.f32 1.442695, %v729_v39 }
 0x628   :  { %2348 = vpow2.f32 %v740_v40 }
 0x632   :  { %v2349_v59 = vpop.eup %2348 }
 0x6c7   :  { %v859_v60 = vpop.f32.mrb[12].mxu1 }
 0x6c8   :  { %v2046_v22 = vpop.f32.mrb[13].mxu1  ;;  %2076 = vmatprep.mubr.msk.f32.mxu1 %vm233_vm1, %v859_v60 }
 0x6cb   :  { %v864_v21 = vpop.f32.mrb[14].mxu1 }
 0x6cc   :  { %v2049_v29 = vpop.f32.mrb[15].mxu1  ;;  %2077 = vmatmul.mubr.msk.f32.vlgmr.msra.gmra.mrb[18].mxu1 %vm233_vm1, %v864_v21  ;;  %v757_v21 = vsel %vm705_vm4, %v2349_v59, 0.0 }
 0x6cf   :  { %v869_v35 = vpop.f32.mrb[16].mxu1  ;;  %v960_v61 = vpop.f32.mrb[10].mxu0 }
 0x6d0   :  { %v2052_v3 = vpop.f32.mrb[17].mxu1  ;;  %v2061_v5 = vpop.f32.mrb[11].mxu0  ;;  %2079 = vmatprep.mubr.msk.f32.mxu1 %vm233_vm1, %v869_v35 }
 0x6d1   :  { %2080 = vmatmul.mubr.msk.f32.gmra.mrb[20].mxu1 %vm233_vm1, %v960_v61  ;;  %v2918_v3 = vld [vmem:[#allocation7 + $0x8] sm:$0xff]  ;;  %v2920_v5 = vld [vmem:[#allocation7 + $0x18] sm:$0xff] }
 0x6d2   :  { %v2195_v8 = vpack.c.bf16 %v2920_v5, %v2918_v3 }
 0x6d4   :  { %2196 = vmatprep.subr.bf16.mxu0 %v2195_v8 }
 0x6d5   :  { %2198 = vmatpush3.bf16.msra.mxu0 %v2195_v8 }
 0x79f   :  { %v2078_v63 = vpop.f32.mrb[18].mxu1 }
 0x7a0   :  { %v1089_v24 = vadd.f32 %v2078_v63, %v2878_v13  ;;  %v1083_v53 = vpop.f32.mrb[19].mxu1  ;;  %v2199_v63 = vpack.c.bf16 %v2926_v33, %v2924_v55 }
 0x7a1   :  { %v1084_v28 = vadd.f32 %v2878_v13, %v1083_v53  ;;  %v2283_v53 = vpack.i.bf16 %v2669_v4, %v2665_v2 }
 0x7a2   :  { %v1113_v14 = vadd.f32 %v1089_v24, %v2745_v9  ;;  %2200 = vmatprep.subr.bf16.mxu0 %v2199_v63  ;;  %v2278_v24 = vpack.i.bf16 %v2663_v1, %v2661_v0 }
 0x7a3   :  { %v1112_v18 = vadd.f32 %v1084_v28, %v2739_v58  ;;  %2202 = vmatpush3.bf16.msra.mxu0 %v2199_v63  ;;  %v2288_v28 = vpack.i.bf16 %v2675_v7, %v2673_v6 }
 0x7a4   :  { %v2081_v62 = vpop.f32.mrb[20].mxu1  ;;  %v1123_v16 = vsel %vm233_vm1, %v1113_v14, 0.0  ;;  %2219 = vmatprep.subr.bf16.mxu0 %v2538_v20 }
 0x7a5   :  { %v1099_v23 = vadd.f32 %v2081_v62, %v2878_v13  ;;  %1124 = vadd.xlane.f32.xlu1 %v1123_v16  ;;  %v1093_v25 = vpop.f32.mrb[21].mxu1  ;;  %v1120_v31 = vsel %vm233_vm1, %v1112_v18, 0.0 }
 0x7a6   :  { %v1094_v26 = vadd.f32 %v2878_v13, %v1093_v25  ;;  %1121 = vadd.xlane.f32.xlu0 %v1120_v31 }
 0x7a7   :  { %v1115_v30 = vadd.f32 %v1099_v23, %v2755_v17 }
 0x7a8   :  { %v1114_v34 = vadd.f32 %v1094_v26, %v2748_v12 }
 0x7a9   :  { %v1129_v9 = vsel %vm233_vm1, %v1115_v30, 0.0 }
 0x7aa   :  { %1130 = vadd.xlane.f32.xlu1 %v1129_v9  ;;  %v1126_v58 = vsel %vm233_vm1, %v1114_v34, 0.0 }
 0x7ab   :  { %1127 = vadd.xlane.f32.xlu0 %v1126_v58 }
 0x7ae   :  { %755 = vadd.xlane.f32.xlu1 %v754_v37 }
 0x832   :  { %v1125_v41 = vpop.xlane.xlu1 %1124 }
 0x833   :  { %v1139_v42 = vmul.f32 0.03125, %v1125_v41  ;;  %v1122_v43 = vpop.xlane.xlu0 %1121 }
 0x834   :  { %v1138_v17 = vmul.f32 0.03125, %v1122_v43 }
 0x835   :  { %v2894_v12 = vsub.f32 %v1113_v14, %v1139_v42  ;;  %v2293_v14 = vpack.i.bf16 %v2682_v11, %v2680_v10  ;;  %v2943_v11 = vld [vmem:[#allocation10 + $0x21] ss:$0 sm:$0xff] }
 0x836   :  { %v2896_v44 = vsub.f32 %v1112_v18, %v1138_v17 }
 0x837   :  { %v1131_v45 = vpop.xlane.xlu1 %1130  ;;  %v1151_v27 = vmul.f32 %v2894_v12, %v2894_v12 }
 0x838   :  { %v1141_v46 = vmul.f32 0.03125, %v1131_v45  ;;  %v1128_v47 = vpop.xlane.xlu0 %1127  ;;  %v1150_v48 = vmul.f32 %v2896_v44, %v2896_v44 }
 0x839   :  { %v1140_v49 = vmul.f32 0.03125, %v1128_v47  ;;  %v1159_v57 = vsel %vm233_vm1, %v1151_v27, 0.0 }
 0x83a   :  { %v1156_v50 = vsel %vm233_vm1, %v1150_v48, 0.0  ;;  %v2903_v51 = vsub.f32 %v1115_v30, %v1141_v46 }
 0x83b   :  { %v2905_v52 = vsub.f32 %v1114_v34, %v1140_v49  ;;  %v756_v54 = vpop.xlane.xlu1 %755  ;;  %1157 = vadd.xlane.f32.xlu0 %v1156_v50  ;;  %v2946_v34 = vld [vmem:[#allocation10 + $0x22] ss:$0 sm:$0xff] }
 0x83c   :  { %2350 = vrcp.f32 %v756_v54  ;;  %v1153_v22 = vmul.f32 %v2903_v51, %v2903_v51 }
 0x83d   :  { %v1152_v56 = vmul.f32 %v2905_v52, %v2905_v52 }
 0x83e   :  { %v1165_v29 = vsel %vm233_vm1, %v1153_v22, 0.0 }
 0x83f   :  { %1160 = vadd.xlane.f32.xlu0 %v1159_v57  ;;  %v1162_v60 = vsel %vm233_vm1, %v1152_v56, 0.0 }
 0x840   :  { %1163 = vadd.xlane.f32.xlu1 %v1162_v60 }
 0x843   :  { %758 = vadd.xlane.f32.xlu0 %v757_v21 }
 0x844   :  { %1166 = vadd.xlane.f32.xlu1 %v1165_v29 }
 0x846   :  { %v2351_v35 = vpop.eup %2350 }
 0x847   :  { %v770_v61 = vmul.f32 %v2351_v35, %v2347_v36 }
 0x849   :  { %2063 = vmatmul.mubr.msk.f32.gmra.mrb[12].mxu0 %vm705_vm4, %v770_v61 }
 0x84a   :  { %2065 = vmatprep.mubr.msk.f32.mxu0 %vm2540_vm2, %v2541_v32 }
 0x855   :  { %2284 = vrot.lane.b32.xlu1 %v2283_v53, %s2539_s30 }
 0x859   :  { %2279 = vrot.lane.b32.xlu0 %v2278_v24, %s2539_s30  ;;  %2289 = vrot.lane.b32.xlu1 %v2288_v28, %s2539_s30  ;;  %v2972_v28 = vld [vmem:[#allocation10 + $0x23] ss:$0 sm:$0xff] }
 0x85d   :  { %2294 = vrot.lane.b32.xlu1 %v2293_v14, %s2539_s30 }
 0x8c8   :  { %v1158_v18 = vpop.xlane.xlu0 %1157 }
 0x8c9   :  { %v1174_v62 = vmul.f32 0.03125, %v1158_v18 }
 0x8cb   :  { %v1180_v0 = vadd.f32 1e-12, %v1174_v62 }
 0x8cc   :  { %v1161_v1 = vpop.xlane.xlu0 %1160 }
 0x8cd   :  { %2352 = vrsqrt.f32 %v1180_v0  ;;  %v1175_v2 = vmul.f32 0.03125, %v1161_v1  ;;  %v1164_v4 = vpop.xlane.xlu1 %1163 }
 0x8ce   :  { %v1176_v16 = vmul.f32 0.03125, %v1164_v4 }
 0x8cf   :  { %v1181_v23 = vadd.f32 1e-12, %v1175_v2 }
 0x8d0   :  { %v1182_v25 = vadd.f32 1e-12, %v1176_v16  ;;  %v759_v31 = vpop.xlane.xlu0 %758 }
 0x8d1   :  { %2354 = vrsqrt.f32 %v1181_v23  ;;  %v1167_v6 = vpop.xlane.xlu1 %1166 }
 0x8d2   :  { %2356 = vrsqrt.f32 %v1182_v25  ;;  %v1177_v7 = vmul.f32 0.03125, %v1167_v6 }
 0x8d3   :  { %2358 = vrcp.f32 %v759_v31 }
 0x8d4   :  { %v1183_v26 = vadd.f32 1e-12, %v1177_v7  ;;  %v2280_v50 = vpop.permute.xlu0 %2279 }
 0x8d5   :  { %v2282_v27 = vunpack.i.h.bf16 %v2280_v50  ;;  %v2285_v54 = vpop.permute.xlu1 %2284 }
 0x8d6   :  { %2360 = vrsqrt.f32 %v1183_v26  ;;  %v2287_v56 = vunpack.i.h.bf16 %v2285_v54  ;;  %v2286_v57 = vunpack.i.l.bf16 %v2285_v54 }
 0x8d7   :  { %v2353_v10 = vpop.eup %2352 }
 0x8d8   :  { %v1192_v30 = vmul.f32 %v2353_v10, %v2896_v44 }
 0x8d9   :  { %v2290_v60 = vpop.permute.xlu1 %2289 }
 0x8da   :  { %v1202_v9 = vmul.f32 %v2943_v11, %v1192_v30  ;;  %v2292_v22 = vunpack.i.h.bf16 %v2290_v60  ;;  %v2291_v21 = vunpack.i.l.bf16 %v2290_v60 }
 0x8db   :  { %v2355_v36 = vpop.eup %2354 }
 0x8dc   :  { %v2357_v58 = vpop.eup %2356  ;;  %v1193_v37 = vmul.f32 %v2355_v36, %v2894_v12  ;;  %v2951_v39 = vadd.f32 %v2946_v34, %v1202_v9  ;;  %v2211_v29 = vpack.c.bf16 %v2292_v22, %v2291_v21 }
 0x8dd   :  { %v2359_v38 = vpop.eup %2358  ;;  %v1194_v40 = vmul.f32 %v2357_v58, %v2905_v52  ;;  %v2281_v52 = vunpack.i.l.bf16 %v2280_v50  ;;  %v2295_v35 = vpop.permute.xlu1 %2294 }
 0x8de   :  { %v1203_v41 = vmul.f32 %v2943_v11, %v1193_v37  ;;  %v771_v42 = vmul.f32 %v2359_v38, %v2349_v59  ;;  %v2207_v59 = vpack.c.bf16 %v2287_v56, %v2286_v57  ;;  %v2297_v61 = vunpack.i.h.bf16 %v2295_v35 }
 0x8df   :  { %v1204_v43 = vmul.f32 %v2943_v11, %v1194_v40  ;;  %v2296_v8 = vunpack.i.l.bf16 %v2295_v35 }
 0x8e0   :  { %v2361_v17 = vpop.eup %2360  ;;  %v1213_v44 = vadd.f32 %v2946_v34, %v1203_v41  ;;  %2066 = vmatmul.mubr.msk.f32.gmra.mrb[14].mxu0 %vm705_vm4, %v771_v42 }
 0x8e1   :  { %2093 = vmatprep.mubr.msk.f32.mxu0 %vm233_vm1, %v2951_v39  ;;  %v1214_v12 = vadd.f32 %v2946_v34, %v1204_v43  ;;  %v1195_v45 = vmul.f32 %v2361_v17, %v2903_v51  ;;  %v2203_v51 = vpack.c.bf16 %v2282_v27, %v2281_v52  ;;  %v2215_v63 = vpack.c.bf16 %v2297_v61, %v2296_v8 }
 0x8e3   :  { %v1205_v46 = vmul.f32 %v2943_v11, %v1195_v45  ;;  %2204 = vmatprep.subr.bf16.mxu1 %v2203_v51 }
 0x8e4   :  { %2094 = vmatmul.mubr.msk.f32.vlgmr.msra.gmra.mrb[16].mxu0 %vm233_vm1, %v1213_v44  ;;  %2206 = vmatpush3.bf16.msra.mxu1 %v2203_v51 }
 0x8e5   :  { %2096 = vmatprep.mubr.msk.f32.mxu0 %vm233_vm1, %v1214_v12  ;;  %v2966_v47 = vadd.f32 %v2946_v34, %v1205_v46  ;;  %2208 = vmatprep.subr.bf16.mxu1 %v2207_v59 }
 0x8e8   :  { %2097 = vmatmul.mubr.msk.f32.gmra.mrb[18].mxu0 %vm233_vm1, %v2966_v47  ;;  %2210 = vmatpush3.bf16.msra.mxu1 %v2207_v59 }
 0x8e9   :  { %2212 = vmatprep.subr.bf16.mxu1 %v2211_v29 }
 0x8ec   :  { %2214 = vmatpush3.bf16.msra.mxu1 %v2211_v29 }
 0x8ed   :  { %2216 = vmatprep.subr.bf16.mxu1 %v2215_v63 }
 0x8f0   :  { %2218 = vmatpush3.bf16.msra.mxu1 %v2215_v63 }
 0x91c   :  { %v965_v48 = vpop.f32.mrb[12].mxu0 }
 0x91d   :  { %v2064_v49 = vpop.f32.mrb[13].mxu0  ;;  %2082 = vmatprep.mubr.msk.f32.mxu1 %vm233_vm1, %v965_v48 }
 0x9b3   :  { %v970_v24 = vpop.f32.mrb[14].mxu0 }
 0x9b4   :  { %v2067_v53 = vpop.f32.mrb[15].mxu0  ;;  %2083 = vmatmul.mubr.msk.f32.gmra.mrb[22].mxu1 %vm233_vm1, %v970_v24 }
 0x9b7   :  { %v2095_v14 = vpop.f32.mrb[16].mxu0 }
 0x9b8   :  { %v1317_v18 = vadd.f32 %v2095_v14, %v2972_v28  ;;  %v1311_v62 = vpop.f32.mrb[17].mxu0 }
 0x9b9   :  { %v1312_v0 = vadd.f32 %v2972_v28, %v1311_v62 }
 0x9ba   :  { %v1341_v1 = vmul.f32 %v1317_v18, %v1317_v18 }
 0x9bb   :  { %v1340_v2 = vmul.f32 %v1312_v0, %v1312_v0  ;;  %v2098_v4 = vpop.f32.mrb[18].mxu0 }
 0x9bc   :  { %v1347_v16 = vmul.f32 %v1341_v1, %v1317_v18  ;;  %v1327_v23 = vadd.f32 %v2098_v4, %v2972_v28  ;;  %v1321_v25 = vpop.f32.mrb[19].mxu0  ;;  %v1866_v1 = vld [vmem:[#allocation10 + $0x24] ss:$0 sm:$0xff] }
 0x9bd   :  { %v1346_v31 = vmul.f32 %v1340_v2, %v1312_v0  ;;  %v1322_v6 = vadd.f32 %v2972_v28, %v1321_v25 }
 0x9be   :  { %v1353_v7 = vmul.f32 0.044715, %v1347_v16  ;;  %v1343_v26 = vmul.f32 %v1327_v23, %v1327_v23 }
 0x9bf   :  { %v1352_v10 = vmul.f32 0.044715, %v1346_v31  ;;  %v1342_v30 = vmul.f32 %v1322_v6, %v1322_v6 }
 0x9c0   :  { %v1359_v9 = vadd.f32 %v1353_v7, %v1317_v18  ;;  %v1349_v36 = vmul.f32 %v1343_v26, %v1327_v23 }
 0x9c1   :  { %v1358_v58 = vadd.f32 %v1352_v10, %v1312_v0  ;;  %v1348_v37 = vmul.f32 %v1342_v30, %v1322_v6 }
 0x9c2   :  { %v1365_v38 = vmul.f32 0.7978846, %v1359_v9  ;;  %v1355_v40 = vmul.f32 0.044715, %v1349_v36 }
 0x9c3   :  { %v1364_v41 = vmul.f32 0.7978846, %v1358_v58  ;;  %v1354_v42 = vmul.f32 0.044715, %v1348_v37 }
 0x9c4   :  { %2362 = vtanh.f32 %v1365_v38  ;;  %v1361_v43 = vadd.f32 %v1355_v40, %v1327_v23 }
 0x9c5   :  { %2364 = vtanh.f32 %v1364_v41  ;;  %v1360_v17 = vadd.f32 %v1354_v42, %v1322_v6 }
 0x9c6   :  { %v1367_v44 = vmul.f32 0.7978846, %v1361_v43 }
 0x9c7   :  { %v1366_v12 = vmul.f32 0.7978846, %v1360_v17 }
 0x9c8   :  { %2366 = vtanh.f32 %v1367_v44 }
 0x9c9   :  { %2368 = vtanh.f32 %v1366_v12 }
 0x9ce   :  { %v2363_v45 = vpop.eup %2362 }
 0x9cf   :  { %v2365_v46 = vpop.eup %2364  ;;  %v1377_v48 = vadd.f32 1.0, %v2363_v45  ;;  %v2303_v45 = vpack.i.bf16 %v2926_v33, %v2924_v55 }
 0x9d0   :  { %v1376_v49 = vadd.f32 1.0, %v2365_v46  ;;  %v2298_v46 = vpack.i.bf16 %v2920_v5, %v2918_v3 }
 0x9d1   :  { %v1383_v50 = vmul.f32 0.5, %v1377_v48 }
 0x9d2   :  { %v2367_v27 = vpop.eup %2366  ;;  %v1382_v52 = vmul.f32 0.5, %v1376_v49 }
 0x9d3   :  { %v2369_v51 = vpop.eup %2368  ;;  %v1379_v54 = vadd.f32 1.0, %v2367_v27  ;;  %v1389_v59 = vmul.f32 %v1383_v50, %v1317_v18 }
 0x9d4   :  { %v1388_v56 = vmul.f32 %v1382_v52, %v1312_v0  ;;  %v1378_v57 = vadd.f32 1.0, %v2369_v51 }
 0x9d5   :  { %v1385_v60 = vmul.f32 0.5, %v1379_v54 }
 0x9d6   :  { %2118 = vmatprep.mubr.msk.f32.mxu1 %vm108_vm0, %v1388_v56  ;;  %v1384_v22 = vmul.f32 0.5, %v1378_v57 }
 0x9d7   :  { %2119 = vmatmul.mubr.msk.f32.vlgmr.msra.gmra.mrb[24].mxu1 %vm108_vm0, %v1389_v59  ;;  %v1391_v29 = vmul.f32 %v1385_v60, %v1327_v23 }
 0x9d8   :  { %v1390_v21 = vmul.f32 %v1384_v22, %v1322_v6 }
 0x9da   :  { %2121 = vmatprep.mubr.msk.f32.mxu1 %vm108_vm0, %v1390_v21 }
 0x9db   :  { %2122 = vmatmul.mubr.msk.f32.gmra.mrb[26].mxu1 %vm108_vm0, %v1391_v29 }
 0xa87   :  { %v2084_v35 = vpop.f32.mrb[22].mxu1 }
 0xa88   :  { %v1109_v61 = vadd.f32 %v2084_v35, %v2878_v13  ;;  %v1103_v8 = vpop.f32.mrb[23].mxu1 }
 0xa89   :  { %v1104_v63 = vadd.f32 %v2878_v13, %v1103_v8 }
 0xa8a   :  { %v1117_v24 = vadd.f32 %v1109_v61, %v2764_v15 }
 0xa8b   :  { %v1116_v53 = vadd.f32 %v1104_v63, %v2758_v19 }
 0xa8c   :  { %v1135_v14 = vsel %vm233_vm1, %v1117_v24, 0.0 }
 0xa8d   :  { %1136 = vadd.xlane.f32.xlu1 %v1135_v14  ;;  %v1132_v18 = vsel %vm233_vm1, %v1116_v53, 0.0 }
 0xa8e   :  { %1133 = vadd.xlane.f32.xlu0 %v1132_v18 }
 0xaaa   :  { %v2120_v62 = vpop.f32.mrb[24].mxu1 }
 0xaab   :  { %v1523_v0 = vpop.f32.mrb[25].mxu1 }
 0xaac   :  { %v1524_v4 = vadd.f32 %v1866_v1, %v1523_v0  ;;  %v1873_v0 = vld [vmem:[#allocation10 + $0x25] ss:$0 sm:$0xff] }
 0xaae   :  { %v2123_v2 = vpop.f32.mrb[26].mxu1  ;;  %v1548_v15 = vadd.f32 %v1524_v4, %v2951_v39 }
 0xaaf   :  { %v1537_v16 = vadd.f32 %v2123_v2, %v1866_v1  ;;  %v1532_v23 = vpop.f32.mrb[27].mxu1  ;;  %v1874_v2 = vld [vmem:[#allocation10 + $0x26] ss:$0 sm:$0xff] }
 0xab0   :  { %v1552_v19 = vsel %vm233_vm1, %v1548_v15, 0.0 }
 0xab1   :  { %v1549_v25 = vadd.f32 %v1537_v16, %v2966_v47 }
 0xab3   :  { %v1555_v13 = vsel %vm233_vm1, %v1549_v25, 0.0 }
 0xab4   :  { %1556 = vadd.xlane.f32.xlu0 %v1555_v13 }
 0xab8   :  { %1553 = vadd.xlane.f32.xlu0 %v1552_v19 }
 0xb1a   :  { %v1137_v31 = vpop.xlane.xlu1 %1136 }
 0xb1b   :  { %v1143_v6 = vmul.f32 0.03125, %v1137_v31  ;;  %v1134_v7 = vpop.xlane.xlu0 %1133 }
 0xb1c   :  { %v1142_v26 = vmul.f32 0.03125, %v1134_v7 }
 0xb1d   :  { %v1149_v10 = vsub.f32 %v1117_v24, %v1143_v6 }
 0xb1e   :  { %v1148_v30 = vsub.f32 %v1116_v53, %v1142_v26 }
 0xb1f   :  { %v1155_v9 = vmul.f32 %v1149_v10, %v1149_v10 }
 0xb20   :  { %v1154_v36 = vmul.f32 %v1148_v30, %v1148_v30 }
 0xb21   :  { %v1171_v58 = vsel %vm233_vm1, %v1155_v9, 0.0 }
 0xb22   :  { %1172 = vadd.xlane.f32.xlu1 %v1171_v58  ;;  %v1168_v47 = vsel %vm233_vm1, %v1154_v36, 0.0 }
 0xb23   :  { %1169 = vadd.xlane.f32.xlu0 %v1168_v47 }
 0xb41   :  { %v1557_v37 = vpop.xlane.xlu0 %1556 }
 0xb42   :  { %v1559_v39 = vmul.f32 0.03125, %v1557_v37 }
 0xb44   :  { %v1561_v38 = vsub.f32 %v1549_v25, %v1559_v39 }
 0xb45   :  { %v1554_v40 = vpop.xlane.xlu0 %1553 }
 0xb46   :  { %v1558_v41 = vmul.f32 0.03125, %v1554_v40  ;;  %v1563_v42 = vmul.f32 %v1561_v38, %v1561_v38 }
 0xb48   :  { %v1560_v43 = vsub.f32 %v1548_v15, %v1558_v41  ;;  %v1567_v17 = vsel %vm233_vm1, %v1563_v42, 0.0 }
 0xb49   :  { %1568 = vadd.xlane.f32.xlu0 %v1567_v17 }
 0xb4a   :  { %v1562_v44 = vmul.f32 %v1560_v43, %v1560_v43 }
 0xb4c   :  { %v1564_v12 = vsel %vm233_vm1, %v1562_v44, 0.0 }
 0xb4d   :  { %1565 = vadd.xlane.f32.xlu1 %v1564_v12 }
 0xb5e   :  { %2304 = vrot.lane.b32.xlu1 %v2303_v45, %s2542_s6 }
 0xb5f   :  { %2299 = vrot.lane.b32.xlu0 %v2298_v46, %s2542_s6 }
 0xb62   :  { %2309 = vrot.lane.b32.xlu1 %v2298_v46, %s2537_s4 }
 0xb66   :  { %2314 = vrot.lane.b32.xlu1 %v2303_v45, %s2537_s4 }
 0xbaf   :  { %v1173_v48 = vpop.xlane.xlu1 %1172 }
 0xbb0   :  { %v1179_v49 = vmul.f32 0.03125, %v1173_v48  ;;  %v1170_v50 = vpop.xlane.xlu0 %1169 }
 0xbb1   :  { %v1178_v27 = vmul.f32 0.03125, %v1170_v50 }
 0xbb2   :  { %v1185_v52 = vadd.f32 1e-12, %v1179_v49 }
 0xbb3   :  { %v1184_v51 = vadd.f32 1e-12, %v1178_v27 }
 0xbb4   :  { %2370 = vrsqrt.f32 %v1185_v52 }
 0xbb5   :  { %2372 = vrsqrt.f32 %v1184_v51 }
 0xbbe   :  { %v2371_v55 = vpop.eup %2370 }
 0xbbf   :  { %v2373_v33 = vpop.eup %2372  ;;  %v1197_v54 = vmul.f32 %v2371_v55, %v1149_v10  ;;  %v1875_v55 = vld [vmem:[#allocation10 + $0x27] ss:$0 sm:$0xff] }
 0xbc0   :  { %v1196_v3 = vmul.f32 %v2373_v33, %v1148_v30 }
 0xbc1   :  { %v1207_v5 = vmul.f32 %v2943_v11, %v1197_v54 }
 0xbc2   :  { %v1206_v56 = vmul.f32 %v2943_v11, %v1196_v3 }
 0xbc3   :  { %v1217_v59 = vadd.f32 %v2946_v34, %v1207_v5 }
 0xbc4   :  { %v1216_v57 = vadd.f32 %v2946_v34, %v1206_v56 }
 0xbc6   :  { %2099 = vmatprep.mubr.msk.f32.mxu0 %vm233_vm1, %v1216_v57 }
 0xbc7   :  { %2100 = vmatmul.mubr.msk.f32.gmra.mrb[20].mxu0 %vm233_vm1, %v1217_v59  ;;  %v1877_v59 = vld [vmem:[#allocation10 + $0x28] ss:$0 sm:$0xff] }
 0xbc8   :  { %2135 = vmatprep.mubr.msk.f32.mxu0 %vm2540_vm2, %v2541_v32 }
 0xbd6   :  { %v1569_v60 = vpop.xlane.xlu0 %1568 }
 0xbd7   :  { %v1571_v22 = vmul.f32 0.03125, %v1569_v60 }
 0xbd9   :  { %v1573_v21 = vadd.f32 1e-12, %v1571_v22 }
 0xbda   :  { %v1566_v29 = vpop.xlane.xlu1 %1565  ;;  %v2300_v35 = vpop.permute.xlu0 %2299 }
 0xbdb   :  { %2374 = vrsqrt.f32 %v1573_v21  ;;  %v1570_v61 = vmul.f32 0.03125, %v1566_v29  ;;  %v2302_v8 = vunpack.i.h.bf16 %v2300_v35  ;;  %v2301_v11 = vunpack.i.l.bf16 %v2300_v35 }
 0xbdd   :  { %v1572_v63 = vadd.f32 1e-12, %v1570_v61  ;;  %v2220_v24 = vpack.c.bf16 %v2302_v8, %v2301_v11 }
 0xbde   :  { %v2305_v53 = vpop.permute.xlu1 %2304 }
 0xbdf   :  { %2376 = vrsqrt.f32 %v1572_v63  ;;  %v2307_v34 = vunpack.i.h.bf16 %v2305_v53  ;;  %v2306_v14 = vunpack.i.l.bf16 %v2305_v53  ;;  %2221 = vmatpush3.bf16.msra.mxu0 %v2220_v24 }
 0xbe0   :  { %2222 = vmatprep.subr.bf16.mxu0 %v2538_v20 }
 0xbe1   :  { %v2223_v18 = vpack.c.bf16 %v2307_v34, %v2306_v14 }
 0xbe2   :  { %v2310_v6 = vpop.permute.xlu1 %2309 }
 0xbe3   :  { %2224 = vmatpush3.bf16.msra.mxu0 %v2223_v18  ;;  %v2312_v7 = vunpack.i.h.bf16 %v2310_v6  ;;  %v2311_v26 = vunpack.i.l.bf16 %v2310_v6 }
 0xbe4   :  { %2225 = vmatprep.subr.bf16.mxu0 %v2538_v20 }
 0xbe5   :  { %v2375_v62 = vpop.eup %2374  ;;  %v2226_v10 = vpack.c.bf16 %v2312_v7, %v2311_v26 }
 0xbe6   :  { %v1577_v1 = vmul.f32 %v2375_v62, %v1561_v38  ;;  %v2315_v30 = vpop.permute.xlu1 %2314 }
 0xbe7   :  { %v2317_v9 = vunpack.i.h.bf16 %v2315_v30  ;;  %v2316_v36 = vunpack.i.l.bf16 %v2315_v30 }
 0xbe8   :  { %v1583_v4 = vmul.f32 %v1873_v0, %v1577_v1 }
 0xbe9   :  { %v2377_v16 = vpop.eup %2376  ;;  %v2229_v58 = vpack.c.bf16 %v2317_v9, %v2316_v36 }
 0xbea   :  { %v1576_v23 = vmul.f32 %v2377_v16, %v1560_v43  ;;  %v1589_v25 = vadd.f32 %v1874_v2, %v1583_v4 }
 0xbec   :  { %v1582_v13 = vmul.f32 %v1873_v0, %v1576_v23  ;;  %v1591_v19 = vrot.slane %v1589_v25, 7 }
 0xbee   :  { %v1588_v15 = vadd.f32 %v1874_v2, %v1582_v13 }
 0xbf0   :  { %v1594_v31 = vsel %vm1593_vm5, %v1588_v15, %v1591_v19 }
 0xbf1   :  { %2136 = vmatmul.mubr.msk.f32.vlgmr.msra.gmra.mrb[22].mxu0 %vm233_vm1, %v1594_v31 }
 0xbf2   :  { %2146 = vmatprep.mubr.msk.f32.mxu0 %vm2540_vm2, %v2541_v32  ;;  %2227 = vmatpush3.bf16.msra.mxu0 %v2226_v10 }
 0xbf3   :  { %2228 = vmatprep.subr.bf16.mxu0 %v2538_v20 }
 0xbf6   :  { %2230 = vmatpush3.bf16.msra.mxu0 %v2229_v58 }
 0xc9a   :  { %v2101_v47 = vpop.f32.mrb[20].mxu0 }
 0xc9b   :  { %v1337_v37 = vadd.f32 %v2101_v47, %v2972_v28  ;;  %v1331_v39 = vpop.f32.mrb[21].mxu0 }
 0xc9c   :  { %v1332_v38 = vadd.f32 %v2972_v28, %v1331_v39 }
 0xc9d   :  { %v1345_v40 = vmul.f32 %v1337_v37, %v1337_v37 }
 0xc9e   :  { %v1344_v32 = vmul.f32 %v1332_v38, %v1332_v38 }
 0xc9f   :  { %v1351_v41 = vmul.f32 %v1345_v40, %v1337_v37 }
 0xca0   :  { %v1350_v42 = vmul.f32 %v1344_v32, %v1332_v38 }
 0xca1   :  { %v1357_v43 = vmul.f32 0.044715, %v1351_v41 }
 0xca2   :  { %v1356_v17 = vmul.f32 0.044715, %v1350_v42 }
 0xca3   :  { %v1363_v44 = vadd.f32 %v1357_v43, %v1337_v37 }
 0xca4   :  { %v1362_v12 = vadd.f32 %v1356_v17, %v1332_v38 }
 0xca5   :  { %v1369_v45 = vmul.f32 0.7978846, %v1363_v44 }
 0xca6   :  { %v1368_v46 = vmul.f32 0.7978846, %v1362_v12 }
 0xca7   :  { %2378 = vtanh.f32 %v1369_v45 }
 0xca8   :  { %2380 = vtanh.f32 %v1368_v46 }
 0xcb1   :  { %v2379_v20 = vpop.eup %2378 }
 0xcb2   :  { %v2381_v48 = vpop.eup %2380  ;;  %v1381_v49 = vadd.f32 1.0, %v2379_v20 }
 0xcb3   :  { %v1380_v50 = vadd.f32 1.0, %v2381_v48 }
 0xcb4   :  { %v1387_v27 = vmul.f32 0.5, %v1381_v49 }
 0xcb5   :  { %v1386_v52 = vmul.f32 0.5, %v1380_v50 }
 0xcb6   :  { %v1393_v28 = vmul.f32 %v1387_v27, %v1337_v37 }
 0xcb7   :  { %v1392_v51 = vmul.f32 %v1386_v52, %v1332_v38 }
 0xcb9   :  { %2124 = vmatprep.mubr.msk.f32.mxu1 %vm108_vm0, %v1392_v51 }
 0xcba   :  { %2125 = vmatmul.mubr.msk.f32.gmra.mrb[28].mxu1 %vm108_vm0, %v1393_v28 }
 0xcc4   :  { %v1685_v33 = vpop.f32.mrb[22].mxu0 }
 0xcc5   :  { %v1686_v54 = vadd.f32 %v1875_v55, %v1685_v33  ;;  %v2137_v3 = vpop.f32.mrb[23].mxu0 }
 0xcc7   :  { %2382 = vtanh.f32 %v1686_v54 }
 0xcd1   :  { %v2383_v5 = vpop.eup %2382 }
 0xcd2   :  { %2147 = vmatmul.mubr.msk.f32.vlgmr.msra.gmra.mrb[24].mxu0 %vm233_vm1, %v2383_v5 }
 0xd8d   :  { %v2126_v56 = vpop.f32.mrb[28].mxu1 }
 0xd8e   :  { %v1541_v57 = vpop.f32.mrb[29].mxu1 }
 0xda5   :  { %v1776_v60 = vpop.f32.mrb[24].mxu0 }
 0xda6   :  { %v1777_v22 = vadd.f32 %v1877_v59, %v1776_v60  ;;  %v2148_v21 = vpop.f32.mrb[25].mxu0 }
 0xda8   :  { %v1782_v29 = vsel %vm1780_vm6, %v1777_v22, -inf  ;;  %1781 = vst.msk [vmem:[#allocation11] sm:$0x3] %vm1780_vm6, %v1777_v22 }
 0xda9   :  { %1783 = vmax.xlane.f32.xlu0 %v1782_v29 }
 0xe36   :  { %v1784_v35 = vpop.xlane.xlu0 %1783 }
 0xe37   :  { %v1785_v61 = vsub.f32 %v1777_v22, %v1784_v35 }
 0xe39   :  { %v1786_v8 = vmul.f32 1.442695, %v1785_v61 }
 0xe3b   :  { %2384 = vpow2.f32 %v1786_v8 }
 0xe45   :  { %v2385_v11 = vpop.eup %2384 }
 0xe46   :  { %v1788_v63 = vsel %vm1780_vm6, %v2385_v11, 0.0 }
 0xe47   :  { %1789 = vadd.xlane.f32.xlu1 %v1788_v63 }
 0xed4   :  { %v1790_v24 = vpop.xlane.xlu1 %1789 }
 0xed5   :  { %2386 = vrcp.f32 %v1790_v24 }
 0xedf   :  { %v2387_v53 = vpop.eup %2386 }
 0xee0   :  { %v1792_v34 = vmul.f32 %v2387_v53, %v2385_v11 }
 0xee2   :  { %1794 = vst.msk [vmem:[#allocation11 + $0x2] sm:$0x3] %vm1780_vm6, %v1792_v34 }
 0xee3   :  { %2509 = shalt.err (!%p2506_p2)
}
 0xee4   :  { %s2510_s10 = scalar_lea.hbm %s3046_s5, 64 }
 0xee5   :  { %p2511_p3 = scmp.ne.s32.totalorder %s3046_s5, %s2510_s10  ;;  %p2514_p4 = scmp.lt.u32.totalorder %s2510_s10, %s3046_s5 }
 0xee7   :  { %p2516_p5 = pnand %p2514_p4, %p2511_p3 }
 0xee9   :  { %2519 = shalt.err (!%p2516_p5)
}
 0xeea   :  { %s2544_s15 = smov 2  }
 0xeeb   :  { %1806 = dma.vmem_to_hbm [thread:$0]  %s1801_s21, 64, %s3046_s5, [#allocation4], %s2537_s4, %s2537_s4, %s2544_s15  }
 0xeec   :  { %2526 = dma.done.wait [#allocation4], 64  }
 0xeed   :  { %2527 = vsyncadd [#allocation4], 4294967232 }
 0xeee   :  { %1810 = vsyncpa [#allocation3], 1 }
 0xeef   :  { %1811 = vsyncpa [#allocation6], 1 }
 0xef0   :  { %1812 = vsyncpa [#allocation9], 1 }
 0xef1   :  { %1813 = vsyncpa [#allocation4], 1 }

</bundles_post_ra>
